<compile_context>
chip_gen: v7x
topology: tpu7x:2x2x1
jax: 0.10.0
libtpu: 0.0.40
codegen_flags: <defaults>
</compile_context>

<pallas_src>
import functools

import jax
import jax.numpy as jnp
from jax.experimental import pallas as pl
from jax.experimental.pallas import tpu as pltpu


def _round_up(x, m):
    return ((x + m - 1) // m) * m


def _pick_batch_tile(batch, cp, max_rows=256):
    """Largest batch divisor with bt*cp <= max_rows, preferring >=2 grid steps
    (so both TensorCores get work under dimension_semantics=('parallel',))."""
    candidates = [d for d in range(1, batch + 1)
                  if batch % d == 0 and d * cp <= max_rows]
    if not candidates:
        return 1
    multi = [d for d in candidates if batch // d >= 2]
    return max(multi) if multi else max(candidates)


def _pad_last(x, npad):
    n = x.shape[-1]
    if n == npad:
        return x
    pad = [(0, 0)] * (x.ndim - 1) + [(0, npad - n)]
    return jnp.pad(x, pad)


def _pad_square(x, npad):
    n = x.shape[0]
    if n == npad:
        return x
    return jnp.pad(x, ((0, npad - n), (0, npad - n)))


# --------------------------------------------------------------------------
# Pallas kernel: one batch tile of DLGNNGraphConvolution (+ optional GRU gate)
# --------------------------------------------------------------------------
def _dlgnn_gconv_kernel(*refs, bt, cp, npad, k_order, fuse_gate):
    if fuse_gate:
        (x0_ref, pf_ref, pb_ref, pa_ref, w_ref, bias_ref, u_ref, hprev_ref,
         out_ref, xf_ref, xb_ref, xa_ref, xcat_ref) = refs
    else:
        (x0_ref, pf_ref, pb_ref, pa_ref, w_ref, bias_ref,
         out_ref, xf_ref, xb_ref, xa_ref, xcat_ref) = refs
        u_ref = hprev_ref = None

    pf = pf_ref[...]          # (Npad, Npad) bf16, batch-invariant
    pb = pb_ref[...]
    pa = pa_ref[...]

    # ---- hop 0: prebuilt X0^T goes straight into xcat (all 3 directions) ----
    # All copies below are (cp, Npad) tiles at 16-aligned sublane / 128-aligned
    # lane offsets -> unmasked stores.
    for b in range(bt):
        col = pl.ds(b * npad, npad)
        blk = x0_ref[pl.ds(b * cp, cp), :]
        xcat_ref[pl.ds(0 * cp, cp), col] = blk
        xcat_ref[pl.ds(1 * cp, cp), col] = blk
        xcat_ref[pl.ds(2 * cp, cp), col] = blk

    # ---- hops 1..K: one wide matmul per direction per hop -------------------
    # Carriers live in VMEM scratch so vreg live ranges stay bounded.
    for k in range(1, k_order + 1):
        src_f = x0_ref if k == 1 else xf_ref
        src_b = x0_ref if k == 1 else xb_ref
        src_a = x0_ref if k == 1 else xa_ref
        xf_ref[...] = jnp.dot(src_f[...], pf,
                              preferred_element_type=jnp.float32).astype(jnp.bfloat16)
        xb_ref[...] = jnp.dot(src_b[...], pb,
                              preferred_element_type=jnp.float32).astype(jnp.bfloat16)
        xa_ref[...] = jnp.dot(src_a[...], pa,
                              preferred_element_type=jnp.float32).astype(jnp.bfloat16)
        for b in range(bt):
            col = pl.ds(b * npad, npad)
            xcat_ref[pl.ds((3 * k + 0) * cp, cp), col] = xf_ref[pl.ds(b * cp, cp), :]
            xcat_ref[pl.ds((3 * k + 1) * cp, cp), col] = xb_ref[pl.ds(b * cp, cp), :]
            xcat_ref[pl.ds((3 * k + 2) * cp, cp), col] = xa_ref[pl.ds(b * cp, cp), :]

    # ---- fused weight stage: ONE (D, C_all) @ (C_all, bt*Npad) matmul -------
    acc = jnp.dot(w_ref[...], xcat_ref[...],
                  preferred_element_type=jnp.float32)          # (D, bt*Npad) f32
    acc = jnp.maximum(acc + bias_ref[...], 0.0)                # bias + ReLU, once

    if fuse_gate:                                              # graph_conv2 + GRU gate
        c_val = jnp.tanh(acc)                                  # EUP, once on the slab
        for b in range(bt):
            cb = c_val[:, b * npad:(b + 1) * npad]             # lane-aligned slice
            u = u_ref[b]
            out_ref[b] = u * hprev_ref[b] + (1.0 - u) * cb
    else:                                                      # graph_conv1
        act = jax.nn.sigmoid(acc)
        for b in range(bt):
            out_ref[b] = act[:, b * npad:(b + 1) * npad]


# --------------------------------------------------------------------------
# Wrapper around one pallas_call
# --------------------------------------------------------------------------
def _graph_conv_call(x0_stacked, p_ft, p_bt, a_t, w_cat, bias_col, *,
                     batch, bt, cp, npad, k_order, fuse_gate,
                     u_t=None, hprev_t=None):
    d, c_all = w_cat.shape
    grid = (batch // bt,)

    kernel = functools.partial(_dlgnn_gconv_kernel, bt=bt, cp=cp, npad=npad,
                               k_order=k_order, fuse_gate=fuse_gate)

    in_arrays = [x0_stacked, p_ft, p_bt, a_t, w_cat, bias_col]
    # NOTE: the constant-index-map operands (P^T matrices, W, bias) are only
    # fetched once by the pipeline (block index never changes); pl.Buffered(1)
    # would merely save <1 MiB of VMEM here, so default buffering is kept.
    in_specs = [
        pl.BlockSpec((bt * cp, npad), lambda i: (i, 0)),
        pl.BlockSpec((npad, npad), lambda i: (0, 0)),
        pl.BlockSpec((npad, npad), lambda i: (0, 0)),
        pl.BlockSpec((npad, npad), lambda i: (0, 0)),
        pl.BlockSpec((d, c_all), lambda i: (0, 0)),
        pl.BlockSpec((d, 1), lambda i: (0, 0)),
    ]
    if fuse_gate:
        in_arrays += [u_t, hprev_t]
        in_specs += [pl.BlockSpec((bt, d, npad), lambda i: (i, 0, 0))] * 2

    scratch_shapes = [
        pltpu.VMEM((bt * cp, npad), jnp.bfloat16),      # forward hop carrier
        pltpu.VMEM((bt * cp, npad), jnp.bfloat16),      # backward hop carrier
        pltpu.VMEM((bt * cp, npad), jnp.bfloat16),      # adaptive hop carrier
        pltpu.VMEM((c_all, bt * npad), jnp.bfloat16),   # repacked xcat slab
    ]

    # Explicit VMEM budget (double-buffered batch-varying blocks + resident
    # constants + scratch) with 2x headroom, capped to v7x' 64 MiB per core.
    bytes_x0 = bt * cp * npad * 2
    bytes_p = 3 * npad * npad * 2
    bytes_w = d * c_all * 2 + d * 128 * 4
    bytes_gate = (2 * bt * d * npad * 4) if fuse_gate else 0
    bytes_out = bt * d * npad * 4
    bytes_scr = 3 * bt * cp * npad * 2 + c_all * bt * npad * 2
    footprint = (2 * (bytes_x0 + bytes_gate + bytes_out)
                 + 2 * (bytes_p + bytes_w) + bytes_scr)
    vmem_limit = int(min(64 * 1024 * 1024, max(32 * 1024 * 1024, 2 * footprint)))

    flops = 2 * batch * (3 * k_order * cp * npad * npad + d * c_all * npad)
    bytes_accessed = sum(int(a.size) * a.dtype.itemsize for a in in_arrays)
    bytes_accessed += batch * d * npad * 4
    cost = pl.CostEstimate(flops=flops, transcendentals=batch * d * npad,
                           bytes_accessed=bytes_accessed)

    return pl.pallas_call(
        kernel,
        out_shape=jax.ShapeDtypeStruct((batch, d, npad), jnp.float32),
        grid=grid,
        in_specs=in_specs,
        out_specs=pl.BlockSpec((bt, d, npad), lambda i: (i, 0, 0)),
        scratch_shapes=scratch_shapes,
        compiler_params=pltpu.CompilerParams(
            dimension_semantics=("parallel",),
            vmem_limit_bytes=vmem_limit),
        cost_estimate=cost,
    )(*in_arrays)


# --------------------------------------------------------------------------
# Plain-JAX glue (tiny, batch-independent)
# --------------------------------------------------------------------------
def _transition_matrices(adj):
    eps = 1e-10
    p_f = adj / (adj.sum(axis=1)[:, None] + eps)
    adj_t = adj.T
    p_b = adj_t / (adj_t.sum(axis=1)[:, None] + eps)
    return p_f, p_b


def _adaptive_adj(e1, e2):
    return jax.nn.softmax(jnp.maximum(e1 @ e2.T, 0.0), axis=1)


def _build_wcat(wf, wb, wadp, cp):
    """Stack + zero-pad per-hop weights into one (D, 3*(K+1)*Cp) bf16 block
    whose column-block order matches the xcat row-block order (f, b, adp)."""
    kp1, c, _ = wf.shape
    blocks = []
    for k in range(kp1):
        for w in (wf[k], wb[k], wadp):
            blocks.append(jnp.pad(w, ((0, cp - c), (0, 0))))
    return jnp.concatenate(blocks, axis=0).T.astype(jnp.bfloat16)


def _build_x0(inputs_pad, hidden_t_pad, cp):
    """(B, Npad) input + (B, H, Npad) hidden  ->  bf16 (B*Cp, Npad) X0^T stack.
    Feature-row order per graph: [input | hidden rows | zero pad]."""
    b, h, npad = hidden_t_pad.shape
    x0 = jnp.concatenate([inputs_pad[:, None, :], hidden_t_pad], axis=1)
    x0 = jnp.pad(x0, ((0, 0), (0, cp - (h + 1)), (0, 0)))
    return x0.astype(jnp.bfloat16).reshape(b * cp, npad)


def dlgnn_cell_forward(inputs, hidden, adj, params, *, hidden_dim, k_order=2):
    """inputs: (B, N), hidden: (B, N*H)  ->  (new_hidden, new_hidden)."""
    b, n = inputs.shape
    h = hidden_dim
    cp = _round_up(h + 1, 16)                 # padded feature dim (bf16 packing)
    npad = _round_up(n, 128)                  # lane-dense node dim
    bt = _pick_batch_tile(b, cp)

    p_f, p_b = _transition_matrices(adj)
    p_ft = _pad_square(p_f.T, npad).astype(jnp.bfloat16)    # kernel computes X^T @ P^T
    p_bt = _pad_square(p_b.T, npad).astype(jnp.bfloat16)

    inputs_pad = _pad_last(inputs, npad)                      # (B, Npad) f32
    hidden_t = hidden.reshape(b, n, h).transpose(0, 2, 1)     # (B, H, N) f32
    hidden_t_pad = _pad_last(hidden_t, npad)                  # (B, H, Npad) f32
    # TODO(synk): when rolling the cell over time, keep the hidden state in the
    # (B, H, Npad) layout across steps so this transpose/pad disappears.

    # ---- graph_conv1: output_dim = 2H, bias = 1.0, sigmoid fused ------------
    gc1 = params["gc1"]
    a1_t = _pad_square(_adaptive_adj(gc1["E1"], gc1["E2"]).T, npad).astype(jnp.bfloat16)
    w1 = _build_wcat(gc1["Wf"], gc1["Wb"], gc1["Wadp"], cp)
    x0_1 = _build_x0(inputs_pad, hidden_t_pad, cp)
    conc_t = _graph_conv_call(x0_1, p_ft, p_bt, a1_t, w1,
                              gc1["bias"].reshape(2 * h, 1),
                              batch=b, bt=bt, cp=cp, npad=npad,
                              k_order=k_order, fuse_gate=False)   # (B, 2H, Npad)
    # back to the PyTorch flat layout to reproduce torch.chunk-on-flattened
    conc = conc_t[:, :, :n].transpose(0, 2, 1).reshape(b, n * 2 * h)
    r = conc[:, : n * h]
    u = conc[:, n * h:]

    # ---- graph_conv2 (+ fused GRU gate): output_dim = H, bias = 0, tanh -----
    gc2 = params["gc2"]
    a2_t = _pad_square(_adaptive_adj(gc2["E1"], gc2["E2"]).T, npad).astype(jnp.bfloat16)
    w2 = _build_wcat(gc2["Wf"], gc2["Wb"], gc2["Wadp"], cp)
    rh_t_pad = _pad_last((r * hidden).reshape(b, n, h).transpose(0, 2, 1), npad)
    x0_2 = _build_x0(inputs_pad, rh_t_pad, cp)                # r*hidden fused into X0 build
    u_t_pad = _pad_last(u.reshape(b, n, h).transpose(0, 2, 1), npad)
    newh_t = _graph_conv_call(x0_2, p_ft, p_bt, a2_t, w2,
                              gc2["bias"].reshape(h, 1),
                              batch=b, bt=bt, cp=cp, npad=npad,
                              k_order=k_order, fuse_gate=True,
                              u_t=u_t_pad, hprev_t=hidden_t_pad)   # (B, H, Npad)

    new_hidden = newh_t[:, :, :n].transpose(0, 2, 1).reshape(b, n * h)
    return new_hidden, new_hidden


# --------------------------------------------------------------------------
# Deterministic parameter init (xavier_uniform, like reset_parameters)
# --------------------------------------------------------------------------
def _xavier_uniform(key, shape):
    fan_in, fan_out = shape[-2], shape[-1]
    bound = (6.0 / (fan_in + fan_out)) ** 0.5
    return jax.random.uniform(key, shape, jnp.float32, -bound, bound)


def init_gconv_params(key, num_nodes, num_gru_units, output_dim, bias_val, k_order):
    # NOTE: the original module hardcodes E1/E2 as (358, 10); the node count is
    # parameterised here so the synthetic example can stay small.
    ks = jax.random.split(key, 5)
    c = num_gru_units + 1
    return {
        "E1": _xavier_uniform(ks[0], (num_nodes, 10)),
        "E2": _xavier_uniform(ks[1], (num_nodes, 10)),
        "Wf": _xavier_uniform(ks[2], (k_order + 1, c, output_dim)),
        "Wb": _xavier_uniform(ks[3], (k_order + 1, c, output_dim)),
        "Wadp": _xavier_uniform(ks[4], (c, output_dim)),
        "bias": jnp.full((output_dim,), bias_val, jnp.float32),
    }


# --------------------------------------------------------------------------
# Pure-JAX f32 reference (mirrors the PyTorch code) for a sanity check
# --------------------------------------------------------------------------
def _ref_graph_conv(inputs, hidden_flat, adj, p, hidden_dim, output_dim, k_order):
    b, n = inputs.shape
    x = jnp.concatenate([inputs[..., None],
                         hidden_flat.reshape(b, n, hidden_dim)], axis=2)
    p_f, p_b = _transition_matrices(adj)
    a_adp = _adaptive_adj(p["E1"], p["E2"])
    out = jnp.zeros((b, n, output_dim), jnp.float32)
    for k in range(k_order + 1):
        tf = jnp.linalg.matrix_power(p_f, k)
        tb = jnp.linalg.matrix_power(p_b, k)
        ta = jnp.linalg.matrix_power(a_adp, k)
        out = out + jnp.einsum("ij,bjc,cd->bid", tf, x, p["Wf"][k])
        out = out + jnp.einsum("ij,bjc,cd->bid", tb, x, p["Wb"][k])
        out = out + jnp.einsum("ij,bjc,cd->bid", ta, x, p["Wadp"])
    out = jnp.maximum(out + p["bias"], 0.0)
    return out.reshape(b, n * output_dim)


def _ref_cell(inputs, hidden, adj, params, hidden_dim, k_order):
    b, n = inputs.shape
    h = hidden_dim
    conc = jax.nn.sigmoid(
        _ref_graph_conv(inputs, hidden, adj, params["gc1"], h, 2 * h, k_order))
    r, u = conc[:, : n * h], conc[:, n * h:]
    c = jnp.tanh(
        _ref_graph_conv(inputs, r * hidden, adj, params["gc2"], h, h, k_order))
    return u * hidden + (1.0 - u) * c


# --------------------------------------------------------------------------
if __name__ == "__main__":
    B, N, H, K = 8, 16, 8, 2     # batch, num_nodes (=input_dim), hidden_dim, hops

    key = jax.random.PRNGKey(0)
    k_adj, k_in, k_hid, k_gc1, k_gc2 = jax.random.split(key, 5)

    adj = jax.random.uniform(k_adj, (N, N), jnp.float32)      # dense weighted graph
    inputs = jax.random.normal(k_in, (B, N), jnp.float32)
    hidden = jax.random.normal(k_hid, (B, N * H), jnp.float32)

    params = {
        "gc1": init_gconv_params(k_gc1, N, H, 2 * H, 1.0, K),
        "gc2": init_gconv_params(k_gc2, N, H, H, 0.0, K),
    }

    fwd = jax.jit(dlgnn_cell_forward, static_argnames=("hidden_dim", "k_order"))
    new_h, _ = fwd(inputs, hidden, adj, params, hidden_dim=H, k_order=K)
    new_h = jax.block_until_ready(new_h)
    assert new_h.shape == (B, N * H) and new_h.dtype == jnp.float32

    ref = jax.block_until_ready(_ref_cell(inputs, hidden, adj, params, H, K))
    # MXU inputs are bf16 (f32 accumulation), so compare at bf16-level tolerance.
    max_err = float(jnp.max(jnp.abs(new_h - ref)))
    assert jnp.allclose(new_h, ref, rtol=2e-2, atol=2e-2), max_err

    print("KERNEL_OK")
</pallas_src>

<mosaic_0001>
module attributes {stable_mosaic.version = 11 : i64} {
  func.func @_dlgnn_gconv_kernel(%arg0: i32, %arg1: memref<64x128xbf16, #tpu.memory_space<vmem>>, %arg2: memref<128x128xbf16, #tpu.memory_space<vmem>>, %arg3: memref<128x128xbf16, #tpu.memory_space<vmem>>, %arg4: memref<128x128xbf16, #tpu.memory_space<vmem>>, %arg5: memref<16x144xbf16, #tpu.memory_space<vmem>>, %arg6: memref<16x1xf32, #tpu.memory_space<vmem>>, %arg7: memref<4x16x128xf32, #tpu.memory_space<vmem>>, %arg8: memref<64x128xbf16, #tpu.memory_space<vmem>>, %arg9: memref<64x128xbf16, #tpu.memory_space<vmem>>, %arg10: memref<64x128xbf16, #tpu.memory_space<vmem>>, %arg11: memref<144x512xbf16, #tpu.memory_space<vmem>>) attributes {dimension_semantics = [#tpu.dimension_semantics<parallel>], iteration_bounds = array<i64: 2>, scalar_prefetch = 0 : i64, scratch_operands = 4 : i64, tpu.core_type = #tpu.core_type<tc>, window_params = [{transform_indices = @transform_0, window_bounds = array<i64: 64, 128>}, {pipeline_mode = #tpu.pipeline_mode<synchronous>, transform_indices = @transform_1, window_bounds = array<i64: 128, 128>}, {pipeline_mode = #tpu.pipeline_mode<synchronous>, transform_indices = @transform_2, window_bounds = array<i64: 128, 128>}, {pipeline_mode = #tpu.pipeline_mode<synchronous>, transform_indices = @transform_3, window_bounds = array<i64: 128, 128>}, {pipeline_mode = #tpu.pipeline_mode<synchronous>, transform_indices = @transform_4, window_bounds = array<i64: 16, 144>}, {pipeline_mode = #tpu.pipeline_mode<synchronous>, transform_indices = @transform_5, window_bounds = array<i64: 16, 1>}, {transform_indices = @transform_6, window_bounds = array<i64: 4, 16, 128>}]} {
    %c0 = arith.constant 0 : index
    %c0_0 = arith.constant 0 : index
    %0 = vector.load %arg2[%c0, %c0_0] : memref<128x128xbf16, #tpu.memory_space<vmem>>, vector<128x128xbf16>
    %c0_1 = arith.constant 0 : index
    %c0_2 = arith.constant 0 : index
    %1 = vector.load %arg3[%c0_1, %c0_2] : memref<128x128xbf16, #tpu.memory_space<vmem>>, vector<128x128xbf16>
    %c0_3 = arith.constant 0 : index
    %c0_4 = arith.constant 0 : index
    %2 = vector.load %arg4[%c0_3, %c0_4] : memref<128x128xbf16, #tpu.memory_space<vmem>>, vector<128x128xbf16>
    %c0_5 = arith.constant 0 : index
    %c0_6 = arith.constant 0 : index
    %3 = vector.load %arg1[%c0_5, %c0_6] : memref<64x128xbf16, #tpu.memory_space<vmem>>, vector<16x128xbf16>
    %c0_7 = arith.constant 0 : index
    %c0_8 = arith.constant 0 : index
    %4 = vector.load %arg11[%c0_7, %c0_8] : memref<144x512xbf16, #tpu.memory_space<vmem>>, vector<16x128xbf16>
    tpu.vector_store %arg11[%c0_7, %c0_8], %3 {strides = array<i32>} : memref<144x512xbf16, #tpu.memory_space<vmem>>, vector<16x128xbf16>,
    %c16 = arith.constant 16 : index
    %c0_9 = arith.constant 0 : index
    %5 = vector.load %arg11[%c16, %c0_9] : memref<144x512xbf16, #tpu.memory_space<vmem>>, vector<16x128xbf16>
    tpu.vector_store %arg11[%c16, %c0_9], %3 {strides = array<i32>} : memref<144x512xbf16, #tpu.memory_space<vmem>>, vector<16x128xbf16>,
    %c32 = arith.constant 32 : index
    %c0_10 = arith.constant 0 : index
    %6 = vector.load %arg11[%c32, %c0_10] : memref<144x512xbf16, #tpu.memory_space<vmem>>, vector<16x128xbf16>
    tpu.vector_store %arg11[%c32, %c0_10], %3 {strides = array<i32>} : memref<144x512xbf16, #tpu.memory_space<vmem>>, vector<16x128xbf16>,
    %c16_11 = arith.constant 16 : index
    %c0_12 = arith.constant 0 : index
    %7 = vector.load %arg1[%c16_11, %c0_12] : memref<64x128xbf16, #tpu.memory_space<vmem>>, vector<16x128xbf16>
    %c0_13 = arith.constant 0 : index
    %c128 = arith.constant 128 : index
    %8 = vector.load %arg11[%c0_13, %c128] : memref<144x512xbf16, #tpu.memory_space<vmem>>, vector<16x128xbf16>
    tpu.vector_store %arg11[%c0_13, %c128], %7 {strides = array<i32>} : memref<144x512xbf16, #tpu.memory_space<vmem>>, vector<16x128xbf16>,
    %c16_14 = arith.constant 16 : index
    %c128_15 = arith.constant 128 : index
    %9 = vector.load %arg11[%c16_14, %c128_15] : memref<144x512xbf16, #tpu.memory_space<vmem>>, vector<16x128xbf16>
    tpu.vector_store %arg11[%c16_14, %c128_15], %7 {strides = array<i32>} : memref<144x512xbf16, #tpu.memory_space<vmem>>, vector<16x128xbf16>,
    %c32_16 = arith.constant 32 : index
    %c128_17 = arith.constant 128 : index
    %10 = vector.load %arg11[%c32_16, %c128_17] : memref<144x512xbf16, #tpu.memory_space<vmem>>, vector<16x128xbf16>
    tpu.vector_store %arg11[%c32_16, %c128_17], %7 {strides = array<i32>} : memref<144x512xbf16, #tpu.memory_space<vmem>>, vector<16x128xbf16>,
    %c32_18 = arith.constant 32 : index
    %c0_19 = arith.constant 0 : index
    %11 = vector.load %arg1[%c32_18, %c0_19] : memref<64x128xbf16, #tpu.memory_space<vmem>>, vector<16x128xbf16>
    %c0_20 = arith.constant 0 : index
    %c256 = arith.constant 256 : index
    %12 = vector.load %arg11[%c0_20, %c256] : memref<144x512xbf16, #tpu.memory_space<vmem>>, vector<16x128xbf16>
    tpu.vector_store %arg11[%c0_20, %c256], %11 {strides = array<i32>} : memref<144x512xbf16, #tpu.memory_space<vmem>>, vector<16x128xbf16>,
    %c16_21 = arith.constant 16 : index
    %c256_22 = arith.constant 256 : index
    %13 = vector.load %arg11[%c16_21, %c256_22] : memref<144x512xbf16, #tpu.memory_space<vmem>>, vector<16x128xbf16>
    tpu.vector_store %arg11[%c16_21, %c256_22], %11 {strides = array<i32>} : memref<144x512xbf16, #tpu.memory_space<vmem>>, vector<16x128xbf16>,
    %c32_23 = arith.constant 32 : index
    %c256_24 = arith.constant 256 : index
    %14 = vector.load %arg11[%c32_23, %c256_24] : memref<144x512xbf16, #tpu.memory_space<vmem>>, vector<16x128xbf16>
    tpu.vector_store %arg11[%c32_23, %c256_24], %11 {strides = array<i32>} : memref<144x512xbf16, #tpu.memory_space<vmem>>, vector<16x128xbf16>,
    %c48 = arith.constant 48 : index
    %c0_25 = arith.constant 0 : index
    %15 = vector.load %arg1[%c48, %c0_25] : memref<64x128xbf16, #tpu.memory_space<vmem>>, vector<16x128xbf16>
    %c0_26 = arith.constant 0 : index
    %c384 = arith.constant 384 : index
    %16 = vector.load %arg11[%c0_26, %c384] : memref<144x512xbf16, #tpu.memory_space<vmem>>, vector<16x128xbf16>
    tpu.vector_store %arg11[%c0_26, %c384], %15 {strides = array<i32>} : memref<144x512xbf16, #tpu.memory_space<vmem>>, vector<16x128xbf16>,
    %c16_27 = arith.constant 16 : index
    %c384_28 = arith.constant 384 : index
    %17 = vector.load %arg11[%c16_27, %c384_28] : memref<144x512xbf16, #tpu.memory_space<vmem>>, vector<16x128xbf16>
    tpu.vector_store %arg11[%c16_27, %c384_28], %15 {strides = array<i32>} : memref<144x512xbf16, #tpu.memory_space<vmem>>, vector<16x128xbf16>,
    %c32_29 = arith.constant 32 : index
    %c384_30 = arith.constant 384 : index
    %18 = vector.load %arg11[%c32_29, %c384_30] : memref<144x512xbf16, #tpu.memory_space<vmem>>, vector<16x128xbf16>
    tpu.vector_store %arg11[%c32_29, %c384_30], %15 {strides = array<i32>} : memref<144x512xbf16, #tpu.memory_space<vmem>>, vector<16x128xbf16>,
    %c0_31 = arith.constant 0 : index
    %c0_32 = arith.constant 0 : index
    %19 = vector.load %arg1[%c0_31, %c0_32] : memref<64x128xbf16, #tpu.memory_space<vmem>>, vector<64x128xbf16>
    %cst = arith.constant dense<0.000000e+00> : vector<64x128xf32>
    %20 = tpu.matmul %19, %0, %cst {dimension_numbers = #tpu.dot_dimension_numbers<[1], [0], [0], [1], [0, 0, 1, 1], [], []>} : vector<64x128xbf16>, vector<128x128xbf16>, vector<64x128xf32> -> vector<64x128xf32>
    %21 = arith.truncf %20 : vector<64x128xf32> to vector<64x128xbf16>
    %c0_33 = arith.constant 0 : index
    %c0_34 = arith.constant 0 : index
    %22 = vector.load %arg8[%c0_33, %c0_34] : memref<64x128xbf16, #tpu.memory_space<vmem>>, vector<64x128xbf16>
    tpu.vector_store %arg8[%c0_33, %c0_34], %21 {strides = array<i32>} : memref<64x128xbf16, #tpu.memory_space<vmem>>, vector<64x128xbf16>,
    %c0_35 = arith.constant 0 : index
    %c0_36 = arith.constant 0 : index
    %23 = vector.load %arg1[%c0_35, %c0_36] : memref<64x128xbf16, #tpu.memory_space<vmem>>, vector<64x128xbf16>
    %cst_37 = arith.constant dense<0.000000e+00> : vector<64x128xf32>
    %24 = tpu.matmul %23, %1, %cst_37 {dimension_numbers = #tpu.dot_dimension_numbers<[1], [0], [0], [1], [0, 0, 1, 1], [], []>} : vector<64x128xbf16>, vector<128x128xbf16>, vector<64x128xf32> -> vector<64x128xf32>
    %25 = arith.truncf %24 : vector<64x128xf32> to vector<64x128xbf16>
    %c0_38 = arith.constant 0 : index
    %c0_39 = arith.constant 0 : index
    %26 = vector.load %arg9[%c0_38, %c0_39] : memref<64x128xbf16, #tpu.memory_space<vmem>>, vector<64x128xbf16>
    tpu.vector_store %arg9[%c0_38, %c0_39], %25 {strides = array<i32>} : memref<64x128xbf16, #tpu.memory_space<vmem>>, vector<64x128xbf16>,
    %c0_40 = arith.constant 0 : index
    %c0_41 = arith.constant 0 : index
    %27 = vector.load %arg1[%c0_40, %c0_41] : memref<64x128xbf16, #tpu.memory_space<vmem>>, vector<64x128xbf16>
    %cst_42 = arith.constant dense<0.000000e+00> : vector<64x128xf32>
    %28 = tpu.matmul %27, %2, %cst_42 {dimension_numbers = #tpu.dot_dimension_numbers<[1], [0], [0], [1], [0, 0, 1, 1], [], []>} : vector<64x128xbf16>, vector<128x128xbf16>, vector<64x128xf32> -> vector<64x128xf32>
    %29 = arith.truncf %28 : vector<64x128xf32> to vector<64x128xbf16>
    %c0_43 = arith.constant 0 : index
    %c0_44 = arith.constant 0 : index
    %30 = vector.load %arg10[%c0_43, %c0_44] : memref<64x128xbf16, #tpu.memory_space<vmem>>, vector<64x128xbf16>
    tpu.vector_store %arg10[%c0_43, %c0_44], %29 {strides = array<i32>} : memref<64x128xbf16, #tpu.memory_space<vmem>>, vector<64x128xbf16>,
    %c0_45 = arith.constant 0 : index
    %c0_46 = arith.constant 0 : index
    %31 = vector.load %arg8[%c0_45, %c0_46] : memref<64x128xbf16, #tpu.memory_space<vmem>>, vector<16x128xbf16>
    %c48_47 = arith.constant 48 : index
    %c0_48 = arith.constant 0 : index
    %32 = vector.load %arg11[%c48_47, %c0_48] : memref<144x512xbf16, #tpu.memory_space<vmem>>, vector<16x128xbf16>
    tpu.vector_store %arg11[%c48_47, %c0_48], %31 {strides = array<i32>} : memref<144x512xbf16, #tpu.memory_space<vmem>>, vector<16x128xbf16>,
    %c0_49 = arith.constant 0 : index
    %c0_50 = arith.constant 0 : index
    %33 = vector.load %arg9[%c0_49, %c0_50] : memref<64x128xbf16, #tpu.memory_space<vmem>>, vector<16x128xbf16>
    %c64 = arith.constant 64 : index
    %c0_51 = arith.constant 0 : index
    %34 = vector.load %arg11[%c64, %c0_51] : memref<144x512xbf16, #tpu.memory_space<vmem>>, vector<16x128xbf16>
    tpu.vector_store %arg11[%c64, %c0_51], %33 {strides = array<i32>} : memref<144x512xbf16, #tpu.memory_space<vmem>>, vector<16x128xbf16>,
    %c0_52 = arith.constant 0 : index
    %c0_53 = arith.constant 0 : index
    %35 = vector.load %arg10[%c0_52, %c0_53] : memref<64x128xbf16, #tpu.memory_space<vmem>>, vector<16x128xbf16>
    %c80 = arith.constant 80 : index
    %c0_54 = arith.constant 0 : index
    %36 = vector.load %arg11[%c80, %c0_54] : memref<144x512xbf16, #tpu.memory_space<vmem>>, vector<16x128xbf16>
    tpu.vector_store %arg11[%c80, %c0_54], %35 {strides = array<i32>} : memref<144x512xbf16, #tpu.memory_space<vmem>>, vector<16x128xbf16>,
    %c16_55 = arith.constant 16 : index
    %c0_56 = arith.constant 0 : index
    %37 = vector.load %arg8[%c16_55, %c0_56] : memref<64x128xbf16, #tpu.memory_space<vmem>>, vector<16x128xbf16>
    %c48_57 = arith.constant 48 : index
    %c128_58 = arith.constant 128 : index
    %38 = vector.load %arg11[%c48_57, %c128_58] : memref<144x512xbf16, #tpu.memory_space<vmem>>, vector<16x128xbf16>
    tpu.vector_store %arg11[%c48_57, %c128_58], %37 {strides = array<i32>} : memref<144x512xbf16, #tpu.memory_space<vmem>>, vector<16x128xbf16>,
    %c16_59 = arith.constant 16 : index
    %c0_60 = arith.constant 0 : index
    %39 = vector.load %arg9[%c16_59, %c0_60] : memref<64x128xbf16, #tpu.memory_space<vmem>>, vector<16x128xbf16>
    %c64_61 = arith.constant 64 : index
    %c128_62 = arith.constant 128 : index
    %40 = vector.load %arg11[%c64_61, %c128_62] : memref<144x512xbf16, #tpu.memory_space<vmem>>, vector<16x128xbf16>
    tpu.vector_store %arg11[%c64_61, %c128_62], %39 {strides = array<i32>} : memref<144x512xbf16, #tpu.memory_space<vmem>>, vector<16x128xbf16>,
    %c16_63 = arith.constant 16 : index
    %c0_64 = arith.constant 0 : index
    %41 = vector.load %arg10[%c16_63, %c0_64] : memref<64x128xbf16, #tpu.memory_space<vmem>>, vector<16x128xbf16>
    %c80_65 = arith.constant 80 : index
    %c128_66 = arith.constant 128 : index
    %42 = vector.load %arg11[%c80_65, %c128_66] : memref<144x512xbf16, #tpu.memory_space<vmem>>, vector<16x128xbf16>
    tpu.vector_store %arg11[%c80_65, %c128_66], %41 {strides = array<i32>} : memref<144x512xbf16, #tpu.memory_space<vmem>>, vector<16x128xbf16>,
    %c32_67 = arith.constant 32 : index
    %c0_68 = arith.constant 0 : index
    %43 = vector.load %arg8[%c32_67, %c0_68] : memref<64x128xbf16, #tpu.memory_space<vmem>>, vector<16x128xbf16>
    %c48_69 = arith.constant 48 : index
    %c256_70 = arith.constant 256 : index
    %44 = vector.load %arg11[%c48_69, %c256_70] : memref<144x512xbf16, #tpu.memory_space<vmem>>, vector<16x128xbf16>
    tpu.vector_store %arg11[%c48_69, %c256_70], %43 {strides = array<i32>} : memref<144x512xbf16, #tpu.memory_space<vmem>>, vector<16x128xbf16>,
    %c32_71 = arith.constant 32 : index
    %c0_72 = arith.constant 0 : index
    %45 = vector.load %arg9[%c32_71, %c0_72] : memref<64x128xbf16, #tpu.memory_space<vmem>>, vector<16x128xbf16>
    %c64_73 = arith.constant 64 : index
    %c256_74 = arith.constant 256 : index
    %46 = vector.load %arg11[%c64_73, %c256_74] : memref<144x512xbf16, #tpu.memory_space<vmem>>, vector<16x128xbf16>
    tpu.vector_store %arg11[%c64_73, %c256_74], %45 {strides = array<i32>} : memref<144x512xbf16, #tpu.memory_space<vmem>>, vector<16x128xbf16>,
    %c32_75 = arith.constant 32 : index
    %c0_76 = arith.constant 0 : index
    %47 = vector.load %arg10[%c32_75, %c0_76] : memref<64x128xbf16, #tpu.memory_space<vmem>>, vector<16x128xbf16>
    %c80_77 = arith.constant 80 : index
    %c256_78 = arith.constant 256 : index
    %48 = vector.load %arg11[%c80_77, %c256_78] : memref<144x512xbf16, #tpu.memory_space<vmem>>, vector<16x128xbf16>
    tpu.vector_store %arg11[%c80_77, %c256_78], %47 {strides = array<i32>} : memref<144x512xbf16, #tpu.memory_space<vmem>>, vector<16x128xbf16>,
    %c48_79 = arith.constant 48 : index
    %c0_80 = arith.constant 0 : index
    %49 = vector.load %arg8[%c48_79, %c0_80] : memref<64x128xbf16, #tpu.memory_space<vmem>>, vector<16x128xbf16>
    %c48_81 = arith.constant 48 : index
    %c384_82 = arith.constant 384 : index
    %50 = vector.load %arg11[%c48_81, %c384_82] : memref<144x512xbf16, #tpu.memory_space<vmem>>, vector<16x128xbf16>
    tpu.vector_store %arg11[%c48_81, %c384_82], %49 {strides = array<i32>} : memref<144x512xbf16, #tpu.memory_space<vmem>>, vector<16x128xbf16>,
    %c48_83 = arith.constant 48 : index
    %c0_84 = arith.constant 0 : index
    %51 = vector.load %arg9[%c48_83, %c0_84] : memref<64x128xbf16, #tpu.memory_space<vmem>>, vector<16x128xbf16>
    %c64_85 = arith.constant 64 : index
    %c384_86 = arith.constant 384 : index
    %52 = vector.load %arg11[%c64_85, %c384_86] : memref<144x512xbf16, #tpu.memory_space<vmem>>, vector<16x128xbf16>
    tpu.vector_store %arg11[%c64_85, %c384_86], %51 {strides = array<i32>} : memref<144x512xbf16, #tpu.memory_space<vmem>>, vector<16x128xbf16>,
    %c48_87 = arith.constant 48 : index
    %c0_88 = arith.constant 0 : index
    %53 = vector.load %arg10[%c48_87, %c0_88] : memref<64x128xbf16, #tpu.memory_space<vmem>>, vector<16x128xbf16>
    %c80_89 = arith.constant 80 : index
    %c384_90 = arith.constant 384 : index
    %54 = vector.load %arg11[%c80_89, %c384_90] : memref<144x512xbf16, #tpu.memory_space<vmem>>, vector<16x128xbf16>
    tpu.vector_store %arg11[%c80_89, %c384_90], %53 {strides = array<i32>} : memref<144x512xbf16, #tpu.memory_space<vmem>>, vector<16x128xbf16>,
    %c0_91 = arith.constant 0 : index
    %c0_92 = arith.constant 0 : index
    %55 = vector.load %arg8[%c0_91, %c0_92] : memref<64x128xbf16, #tpu.memory_space<vmem>>, vector<64x128xbf16>
    %cst_93 = arith.constant dense<0.000000e+00> : vector<64x128xf32>
    %56 = tpu.matmul %55, %0, %cst_93 {dimension_numbers = #tpu.dot_dimension_numbers<[1], [0], [0], [1], [0, 0, 1, 1], [], []>} : vector<64x128xbf16>, vector<128x128xbf16>, vector<64x128xf32> -> vector<64x128xf32>
    %57 = arith.truncf %56 : vector<64x128xf32> to vector<64x128xbf16>
    %c0_94 = arith.constant 0 : index
    %c0_95 = arith.constant 0 : index
    %58 = vector.load %arg8[%c0_94, %c0_95] : memref<64x128xbf16, #tpu.memory_space<vmem>>, vector<64x128xbf16>
    tpu.vector_store %arg8[%c0_94, %c0_95], %57 {strides = array<i32>} : memref<64x128xbf16, #tpu.memory_space<vmem>>, vector<64x128xbf16>,
    %c0_96 = arith.constant 0 : index
    %c0_97 = arith.constant 0 : index
    %59 = vector.load %arg9[%c0_96, %c0_97] : memref<64x128xbf16, #tpu.memory_space<vmem>>, vector<64x128xbf16>
    %cst_98 = arith.constant dense<0.000000e+00> : vector<64x128xf32>
    %60 = tpu.matmul %59, %1, %cst_98 {dimension_numbers = #tpu.dot_dimension_numbers<[1], [0], [0], [1], [0, 0, 1, 1], [], []>} : vector<64x128xbf16>, vector<128x128xbf16>, vector<64x128xf32> -> vector<64x128xf32>
    %61 = arith.truncf %60 : vector<64x128xf32> to vector<64x128xbf16>
    %c0_99 = arith.constant 0 : index
    %c0_100 = arith.constant 0 : index
    %62 = vector.load %arg9[%c0_99, %c0_100] : memref<64x128xbf16, #tpu.memory_space<vmem>>, vector<64x128xbf16>
    tpu.vector_store %arg9[%c0_99, %c0_100], %61 {strides = array<i32>} : memref<64x128xbf16, #tpu.memory_space<vmem>>, vector<64x128xbf16>,
    %c0_101 = arith.constant 0 : index
    %c0_102 = arith.constant 0 : index
    %63 = vector.load %arg10[%c0_101, %c0_102] : memref<64x128xbf16, #tpu.memory_space<vmem>>, vector<64x128xbf16>
    %cst_103 = arith.constant dense<0.000000e+00> : vector<64x128xf32>
    %64 = tpu.matmul %63, %2, %cst_103 {dimension_numbers = #tpu.dot_dimension_numbers<[1], [0], [0], [1], [0, 0, 1, 1], [], []>} : vector<64x128xbf16>, vector<128x128xbf16>, vector<64x128xf32> -> vector<64x128xf32>
    %65 = arith.truncf %64 : vector<64x128xf32> to vector<64x128xbf16>
    %c0_104 = arith.constant 0 : index
    %c0_105 = arith.constant 0 : index
    %66 = vector.load %arg10[%c0_104, %c0_105] : memref<64x128xbf16, #tpu.memory_space<vmem>>, vector<64x128xbf16>
    tpu.vector_store %arg10[%c0_104, %c0_105], %65 {strides = array<i32>} : memref<64x128xbf16, #tpu.memory_space<vmem>>, vector<64x128xbf16>,
    %c0_106 = arith.constant 0 : index
    %c0_107 = arith.constant 0 : index
    %67 = vector.load %arg8[%c0_106, %c0_107] : memref<64x128xbf16, #tpu.memory_space<vmem>>, vector<16x128xbf16>
    %c96 = arith.constant 96 : index
    %c0_108 = arith.constant 0 : index
    %68 = vector.load %arg11[%c96, %c0_108] : memref<144x512xbf16, #tpu.memory_space<vmem>>, vector<16x128xbf16>
    tpu.vector_store %arg11[%c96, %c0_108], %67 {strides = array<i32>} : memref<144x512xbf16, #tpu.memory_space<vmem>>, vector<16x128xbf16>,
    %c0_109 = arith.constant 0 : index
    %c0_110 = arith.constant 0 : index
    %69 = vector.load %arg9[%c0_109, %c0_110] : memref<64x128xbf16, #tpu.memory_space<vmem>>, vector<16x128xbf16>
    %c112 = arith.constant 112 : index
    %c0_111 = arith.constant 0 : index
    %70 = vector.load %arg11[%c112, %c0_111] : memref<144x512xbf16, #tpu.memory_space<vmem>>, vector<16x128xbf16>
    tpu.vector_store %arg11[%c112, %c0_111], %69 {strides = array<i32>} : memref<144x512xbf16, #tpu.memory_space<vmem>>, vector<16x128xbf16>,
    %c0_112 = arith.constant 0 : index
    %c0_113 = arith.constant 0 : index
    %71 = vector.load %arg10[%c0_112, %c0_113] : memref<64x128xbf16, #tpu.memory_space<vmem>>, vector<16x128xbf16>
    %c128_114 = arith.constant 128 : index
    %c0_115 = arith.constant 0 : index
    %72 = vector.load %arg11[%c128_114, %c0_115] : memref<144x512xbf16, #tpu.memory_space<vmem>>, vector<16x128xbf16>
    tpu.vector_store %arg11[%c128_114, %c0_115], %71 {strides = array<i32>} : memref<144x512xbf16, #tpu.memory_space<vmem>>, vector<16x128xbf16>,
    %c16_116 = arith.constant 16 : index
    %c0_117 = arith.constant 0 : index
    %73 = vector.load %arg8[%c16_116, %c0_117] : memref<64x128xbf16, #tpu.memory_space<vmem>>, vector<16x128xbf16>
    %c96_118 = arith.constant 96 : index
    %c128_119 = arith.constant 128 : index
    %74 = vector.load %arg11[%c96_118, %c128_119] : memref<144x512xbf16, #tpu.memory_space<vmem>>, vector<16x128xbf16>
    tpu.vector_store %arg11[%c96_118, %c128_119], %73 {strides = array<i32>} : memref<144x512xbf16, #tpu.memory_space<vmem>>, vector<16x128xbf16>,
    %c16_120 = arith.constant 16 : index
    %c0_121 = arith.constant 0 : index
    %75 = vector.load %arg9[%c16_120, %c0_121] : memref<64x128xbf16, #tpu.memory_space<vmem>>, vector<16x128xbf16>
    %c112_122 = arith.constant 112 : index
    %c128_123 = arith.constant 128 : index
    %76 = vector.load %arg11[%c112_122, %c128_123] : memref<144x512xbf16, #tpu.memory_space<vmem>>, vector<16x128xbf16>
    tpu.vector_store %arg11[%c112_122, %c128_123], %75 {strides = array<i32>} : memref<144x512xbf16, #tpu.memory_space<vmem>>, vector<16x128xbf16>,
    %c16_124 = arith.constant 16 : index
    %c0_125 = arith.constant 0 : index
    %77 = vector.load %arg10[%c16_124, %c0_125] : memref<64x128xbf16, #tpu.memory_space<vmem>>, vector<16x128xbf16>
    %c128_126 = arith.constant 128 : index
    %c128_127 = arith.constant 128 : index
    %78 = vector.load %arg11[%c128_126, %c128_127] : memref<144x512xbf16, #tpu.memory_space<vmem>>, vector<16x128xbf16>
    tpu.vector_store %arg11[%c128_126, %c128_127], %77 {strides = array<i32>} : memref<144x512xbf16, #tpu.memory_space<vmem>>, vector<16x128xbf16>,
    %c32_128 = arith.constant 32 : index
    %c0_129 = arith.constant 0 : index
    %79 = vector.load %arg8[%c32_128, %c0_129] : memref<64x128xbf16, #tpu.memory_space<vmem>>, vector<16x128xbf16>
    %c96_130 = arith.constant 96 : index
    %c256_131 = arith.constant 256 : index
    %80 = vector.load %arg11[%c96_130, %c256_131] : memref<144x512xbf16, #tpu.memory_space<vmem>>, vector<16x128xbf16>
    tpu.vector_store %arg11[%c96_130, %c256_131], %79 {strides = array<i32>} : memref<144x512xbf16, #tpu.memory_space<vmem>>, vector<16x128xbf16>,
    %c32_132 = arith.constant 32 : index
    %c0_133 = arith.constant 0 : index
    %81 = vector.load %arg9[%c32_132, %c0_133] : memref<64x128xbf16, #tpu.memory_space<vmem>>, vector<16x128xbf16>
    %c112_134 = arith.constant 112 : index
    %c256_135 = arith.constant 256 : index
    %82 = vector.load %arg11[%c112_134, %c256_135] : memref<144x512xbf16, #tpu.memory_space<vmem>>, vector<16x128xbf16>
    tpu.vector_store %arg11[%c112_134, %c256_135], %81 {strides = array<i32>} : memref<144x512xbf16, #tpu.memory_space<vmem>>, vector<16x128xbf16>,
    %c32_136 = arith.constant 32 : index
    %c0_137 = arith.constant 0 : index
    %83 = vector.load %arg10[%c32_136, %c0_137] : memref<64x128xbf16, #tpu.memory_space<vmem>>, vector<16x128xbf16>
    %c128_138 = arith.constant 128 : index
    %c256_139 = arith.constant 256 : index
    %84 = vector.load %arg11[%c128_138, %c256_139] : memref<144x512xbf16, #tpu.memory_space<vmem>>, vector<16x128xbf16>
    tpu.vector_store %arg11[%c128_138, %c256_139], %83 {strides = array<i32>} : memref<144x512xbf16, #tpu.memory_space<vmem>>, vector<16x128xbf16>,
    %c48_140 = arith.constant 48 : index
    %c0_141 = arith.constant 0 : index
    %85 = vector.load %arg8[%c48_140, %c0_141] : memref<64x128xbf16, #tpu.memory_space<vmem>>, vector<16x128xbf16>
    %c96_142 = arith.constant 96 : index
    %c384_143 = arith.constant 384 : index
    %86 = vector.load %arg11[%c96_142, %c384_143] : memref<144x512xbf16, #tpu.memory_space<vmem>>, vector<16x128xbf16>
    tpu.vector_store %arg11[%c96_142, %c384_143], %85 {strides = array<i32>} : memref<144x512xbf16, #tpu.memory_space<vmem>>, vector<16x128xbf16>,
    %c48_144 = arith.constant 48 : index
    %c0_145 = arith.constant 0 : index
    %87 = vector.load %arg9[%c48_144, %c0_145] : memref<64x128xbf16, #tpu.memory_space<vmem>>, vector<16x128xbf16>
    %c112_146 = arith.constant 112 : index
    %c384_147 = arith.constant 384 : index
    %88 = vector.load %arg11[%c112_146, %c384_147] : memref<144x512xbf16, #tpu.memory_space<vmem>>, vector<16x128xbf16>
    tpu.vector_store %arg11[%c112_146, %c384_147], %87 {strides = array<i32>} : memref<144x512xbf16, #tpu.memory_space<vmem>>, vector<16x128xbf16>,
    %c48_148 = arith.constant 48 : index
    %c0_149 = arith.constant 0 : index
    %89 = vector.load %arg10[%c48_148, %c0_149] : memref<64x128xbf16, #tpu.memory_space<vmem>>, vector<16x128xbf16>
    %c128_150 = arith.constant 128 : index
    %c384_151 = arith.constant 384 : index
    %90 = vector.load %arg11[%c128_150, %c384_151] : memref<144x512xbf16, #tpu.memory_space<vmem>>, vector<16x128xbf16>
    tpu.vector_store %arg11[%c128_150, %c384_151], %89 {strides = array<i32>} : memref<144x512xbf16, #tpu.memory_space<vmem>>, vector<16x128xbf16>,
    %c0_152 = arith.constant 0 : index
    %c0_153 = arith.constant 0 : index
    %91 = vector.load %arg5[%c0_152, %c0_153] : memref<16x144xbf16, #tpu.memory_space<vmem>>, vector<16x144xbf16>
    %c0_154 = arith.constant 0 : index
    %c0_155 = arith.constant 0 : index
    %92 = vector.load %arg11[%c0_154, %c0_155] : memref<144x512xbf16, #tpu.memory_space<vmem>>, vector<144x512xbf16>
    %cst_156 = arith.constant dense<0.000000e+00> : vector<16x512xf32>
    %93 = tpu.matmul %91, %92, %cst_156 {dimension_numbers = #tpu.dot_dimension_numbers<[1], [0], [0], [1], [0, 0, 1, 1], [], []>} : vector<16x144xbf16>, vector<144x512xbf16>, vector<16x512xf32> -> vector<16x512xf32>
    %c0_157 = arith.constant 0 : index
    %c0_158 = arith.constant 0 : index
    %94 = vector.load %arg6[%c0_157, %c0_158] : memref<16x1xf32, #tpu.memory_space<vmem>>, vector<16x1xf32>
    %95 = vector.broadcast %94 : vector<16x1xf32> to vector<16x512xf32>
    %96 = arith.addf %93, %95 : vector<16x512xf32>
    %cst_159 = arith.constant 0.000000e+00 : f32
    %97 = vector.broadcast %cst_159 : f32 to vector<16x512xf32>
    %98 = arith.maximumf %96, %97 : vector<16x512xf32>
    %99 = arith.negf %98 : vector<16x512xf32>
    %100 = math.exp %99 : vector<16x512xf32>
    %cst_160 = arith.constant 1.000000e+00 : f32
    %101 = vector.broadcast %cst_160 : f32 to vector<16x512xf32>
    %102 = arith.addf %101, %100 : vector<16x512xf32>
    %103 = arith.divf %101, %102 : vector<16x512xf32>
    %104 = vector.extract_strided_slice %103 {offsets = [0, 0], sizes = [16, 128], strides = [1, 1]} : vector<16x512xf32> to vector<16x128xf32>
    %c0_161 = arith.constant 0 : index
    %c0_162 = arith.constant 0 : index
    %c0_163 = arith.constant 0 : index
    %105 = vector.load %arg7[%c0_161, %c0_162, %c0_163] : memref<4x16x128xf32, #tpu.memory_space<vmem>>, vector<1x16x128xf32>
    %106 = vector.shape_cast %105 : vector<1x16x128xf32> to vector<16x128xf32>
    %107 = vector.shape_cast %104 : vector<16x128xf32> to vector<1x16x128xf32>
    tpu.vector_store %arg7[%c0_161, %c0_162, %c0_163], %107 {strides = array<i32>} : memref<4x16x128xf32, #tpu.memory_space<vmem>>, vector<1x16x128xf32>,
    %108 = vector.extract_strided_slice %103 {offsets = [0, 128], sizes = [16, 128], strides = [1, 1]} : vector<16x512xf32> to vector<16x128xf32>
    %c1 = arith.constant 1 : index
    %c0_164 = arith.constant 0 : index
    %c0_165 = arith.constant 0 : index
    %109 = vector.load %arg7[%c1, %c0_164, %c0_165] : memref<4x16x128xf32, #tpu.memory_space<vmem>>, vector<1x16x128xf32>
    %110 = vector.shape_cast %109 : vector<1x16x128xf32> to vector<16x128xf32>
    %111 = vector.shape_cast %108 : vector<16x128xf32> to vector<1x16x128xf32>
    tpu.vector_store %arg7[%c1, %c0_164, %c0_165], %111 {strides = array<i32>} : memref<4x16x128xf32, #tpu.memory_space<vmem>>, vector<1x16x128xf32>,
    %112 = vector.extract_strided_slice %103 {offsets = [0, 256], sizes = [16, 128], strides = [1, 1]} : vector<16x512xf32> to vector<16x128xf32>
    %c2 = arith.constant 2 : index
    %c0_166 = arith.constant 0 : index
    %c0_167 = arith.constant 0 : index
    %113 = vector.load %arg7[%c2, %c0_166, %c0_167] : memref<4x16x128xf32, #tpu.memory_space<vmem>>, vector<1x16x128xf32>
    %114 = vector.shape_cast %113 : vector<1x16x128xf32> to vector<16x128xf32>
    %115 = vector.shape_cast %112 : vector<16x128xf32> to vector<1x16x128xf32>
    tpu.vector_store %arg7[%c2, %c0_166, %c0_167], %115 {strides = array<i32>} : memref<4x16x128xf32, #tpu.memory_space<vmem>>, vector<1x16x128xf32>,
    %116 = vector.extract_strided_slice %103 {offsets = [0, 384], sizes = [16, 128], strides = [1, 1]} : vector<16x512xf32> to vector<16x128xf32>
    %c3 = arith.constant 3 : index
    %c0_168 = arith.constant 0 : index
    %c0_169 = arith.constant 0 : index
    %117 = vector.load %arg7[%c3, %c0_168, %c0_169] : memref<4x16x128xf32, #tpu.memory_space<vmem>>, vector<1x16x128xf32>
    %118 = vector.shape_cast %117 : vector<1x16x128xf32> to vector<16x128xf32>
    %119 = vector.shape_cast %116 : vector<16x128xf32> to vector<1x16x128xf32>
    tpu.vector_store %arg7[%c3, %c0_168, %c0_169], %119 {strides = array<i32>} : memref<4x16x128xf32, #tpu.memory_space<vmem>>, vector<1x16x128xf32>,
    return
  }
  func.func @transform_0(%arg0: i32) -> (i32, i32) {
    %c0_i32 = arith.constant 0 : i32
    %c0_i32_0 = arith.constant 0 : i32
    return %arg0, %c0_i32 : i32, i32
  }
  func.func @transform_1(%arg0: i32) -> (i32, i32) {
    %c0_i32 = arith.constant 0 : i32
    %c0_i32_0 = arith.constant 0 : i32
    %c0_i32_1 = arith.constant 0 : i32
    return %c0_i32, %c0_i32_0 : i32, i32
  }
  func.func @transform_2(%arg0: i32) -> (i32, i32) {
    %c0_i32 = arith.constant 0 : i32
    %c0_i32_0 = arith.constant 0 : i32
    %c0_i32_1 = arith.constant 0 : i32
    return %c0_i32, %c0_i32_0 : i32, i32
  }
  func.func @transform_3(%arg0: i32) -> (i32, i32) {
    %c0_i32 = arith.constant 0 : i32
    %c0_i32_0 = arith.constant 0 : i32
    %c0_i32_1 = arith.constant 0 : i32
    return %c0_i32, %c0_i32_0 : i32, i32
  }
  func.func @transform_4(%arg0: i32) -> (i32, i32) {
    %c0_i32 = arith.constant 0 : i32
    %c0_i32_0 = arith.constant 0 : i32
    %c0_i32_1 = arith.constant 0 : i32
    return %c0_i32, %c0_i32_0 : i32, i32
  }
  func.func @transform_5(%arg0: i32) -> (i32, i32) {
    %c0_i32 = arith.constant 0 : i32
    %c0_i32_0 = arith.constant 0 : i32
    %c0_i32_1 = arith.constant 0 : i32
    return %c0_i32, %c0_i32_0 : i32, i32
  }
  func.func @transform_6(%arg0: i32) -> (i32, i32, i32) {
    %c0_i32 = arith.constant 0 : i32
    %c0_i32_0 = arith.constant 0 : i32
    %c0_i32_1 = arith.constant 0 : i32
    return %arg0, %c0_i32, %c0_i32_0 : i32, i32, i32
  }
}

module attributes {stable_mosaic.version = 11 : i64} {
  func.func @_dlgnn_gconv_kernel(%arg0: i32, %arg1: memref<64x128xbf16, #tpu.memory_space<vmem>>, %arg2: memref<128x128xbf16, #tpu.memory_space<vmem>>, %arg3: memref<128x128xbf16, #tpu.memory_space<vmem>>, %arg4: memref<128x128xbf16, #tpu.memory_space<vmem>>, %arg5: memref<8x144xbf16, #tpu.memory_space<vmem>>, %arg6: memref<8x1xf32, #tpu.memory_space<vmem>>, %arg7: memref<4x8x128xf32, #tpu.memory_space<vmem>>, %arg8: memref<4x8x128xf32, #tpu.memory_space<vmem>>, %arg9: memref<4x8x128xf32, #tpu.memory_space<vmem>>, %arg10: memref<64x128xbf16, #tpu.memory_space<vmem>>, %arg11: memref<64x128xbf16, #tpu.memory_space<vmem>>, %arg12: memref<64x128xbf16, #tpu.memory_space<vmem>>, %arg13: memref<144x512xbf16, #tpu.memory_space<vmem>>) attributes {dimension_semantics = [#tpu.dimension_semantics<parallel>], iteration_bounds = array<i64: 2>, scalar_prefetch = 0 : i64, scratch_operands = 4 : i64, tpu.core_type = #tpu.core_type<tc>, window_params = [{transform_indices = @transform_0, window_bounds = array<i64: 64, 128>}, {pipeline_mode = #tpu.pipeline_mode<synchronous>, transform_indices = @transform_1, window_bounds = array<i64: 128, 128>}, {pipeline_mode = #tpu.pipeline_mode<synchronous>, transform_indices = @transform_2, window_bounds = array<i64: 128, 128>}, {pipeline_mode = #tpu.pipeline_mode<synchronous>, transform_indices = @transform_3, window_bounds = array<i64: 128, 128>}, {pipeline_mode = #tpu.pipeline_mode<synchronous>, transform_indices = @transform_4, window_bounds = array<i64: 8, 144>}, {pipeline_mode = #tpu.pipeline_mode<synchronous>, transform_indices = @transform_5, window_bounds = array<i64: 8, 1>}, {transform_indices = @transform_6, window_bounds = array<i64: 4, 8, 128>}, {transform_indices = @transform_7, window_bounds = array<i64: 4, 8, 128>}, {transform_indices = @transform_8, window_bounds = array<i64: 4, 8, 128>}]} {
    %c0 = arith.constant 0 : index
    %c0_0 = arith.constant 0 : index
    %0 = vector.load %arg2[%c0, %c0_0] : memref<128x128xbf16, #tpu.memory_space<vmem>>, vector<128x128xbf16>
    %c0_1 = arith.constant 0 : index
    %c0_2 = arith.constant 0 : index
    %1 = vector.load %arg3[%c0_1, %c0_2] : memref<128x128xbf16, #tpu.memory_space<vmem>>, vector<128x128xbf16>
    %c0_3 = arith.constant 0 : index
    %c0_4 = arith.constant 0 : index
    %2 = vector.load %arg4[%c0_3, %c0_4] : memref<128x128xbf16, #tpu.memory_space<vmem>>, vector<128x128xbf16>
    %c0_5 = arith.constant 0 : index
    %c0_6 = arith.constant 0 : index
    %3 = vector.load %arg1[%c0_5, %c0_6] : memref<64x128xbf16, #tpu.memory_space<vmem>>, vector<16x128xbf16>
    %c0_7 = arith.constant 0 : index
    %c0_8 = arith.constant 0 : index
    %4 = vector.load %arg13[%c0_7, %c0_8] : memref<144x512xbf16, #tpu.memory_space<vmem>>, vector<16x128xbf16>
    tpu.vector_store %arg13[%c0_7, %c0_8], %3 {strides = array<i32>} : memref<144x512xbf16, #tpu.memory_space<vmem>>, vector<16x128xbf16>,
    %c16 = arith.constant 16 : index
    %c0_9 = arith.constant 0 : index
    %5 = vector.load %arg13[%c16, %c0_9] : memref<144x512xbf16, #tpu.memory_space<vmem>>, vector<16x128xbf16>
    tpu.vector_store %arg13[%c16, %c0_9], %3 {strides = array<i32>} : memref<144x512xbf16, #tpu.memory_space<vmem>>, vector<16x128xbf16>,
    %c32 = arith.constant 32 : index
    %c0_10 = arith.constant 0 : index
    %6 = vector.load %arg13[%c32, %c0_10] : memref<144x512xbf16, #tpu.memory_space<vmem>>, vector<16x128xbf16>
    tpu.vector_store %arg13[%c32, %c0_10], %3 {strides = array<i32>} : memref<144x512xbf16, #tpu.memory_space<vmem>>, vector<16x128xbf16>,
    %c16_11 = arith.constant 16 : index
    %c0_12 = arith.constant 0 : index
    %7 = vector.load %arg1[%c16_11, %c0_12] : memref<64x128xbf16, #tpu.memory_space<vmem>>, vector<16x128xbf16>
    %c0_13 = arith.constant 0 : index
    %c128 = arith.constant 128 : index
    %8 = vector.load %arg13[%c0_13, %c128] : memref<144x512xbf16, #tpu.memory_space<vmem>>, vector<16x128xbf16>
    tpu.vector_store %arg13[%c0_13, %c128], %7 {strides = array<i32>} : memref<144x512xbf16, #tpu.memory_space<vmem>>, vector<16x128xbf16>,
    %c16_14 = arith.constant 16 : index
    %c128_15 = arith.constant 128 : index
    %9 = vector.load %arg13[%c16_14, %c128_15] : memref<144x512xbf16, #tpu.memory_space<vmem>>, vector<16x128xbf16>
    tpu.vector_store %arg13[%c16_14, %c128_15], %7 {strides = array<i32>} : memref<144x512xbf16, #tpu.memory_space<vmem>>, vector<16x128xbf16>,
    %c32_16 = arith.constant 32 : index
    %c128_17 = arith.constant 128 : index
    %10 = vector.load %arg13[%c32_16, %c128_17] : memref<144x512xbf16, #tpu.memory_space<vmem>>, vector<16x128xbf16>
    tpu.vector_store %arg13[%c32_16, %c128_17], %7 {strides = array<i32>} : memref<144x512xbf16, #tpu.memory_space<vmem>>, vector<16x128xbf16>,
    %c32_18 = arith.constant 32 : index
    %c0_19 = arith.constant 0 : index
    %11 = vector.load %arg1[%c32_18, %c0_19] : memref<64x128xbf16, #tpu.memory_space<vmem>>, vector<16x128xbf16>
    %c0_20 = arith.constant 0 : index
    %c256 = arith.constant 256 : index
    %12 = vector.load %arg13[%c0_20, %c256] : memref<144x512xbf16, #tpu.memory_space<vmem>>, vector<16x128xbf16>
    tpu.vector_store %arg13[%c0_20, %c256], %11 {strides = array<i32>} : memref<144x512xbf16, #tpu.memory_space<vmem>>, vector<16x128xbf16>,
    %c16_21 = arith.constant 16 : index
    %c256_22 = arith.constant 256 : index
    %13 = vector.load %arg13[%c16_21, %c256_22] : memref<144x512xbf16, #tpu.memory_space<vmem>>, vector<16x128xbf16>
    tpu.vector_store %arg13[%c16_21, %c256_22], %11 {strides = array<i32>} : memref<144x512xbf16, #tpu.memory_space<vmem>>, vector<16x128xbf16>,
    %c32_23 = arith.constant 32 : index
    %c256_24 = arith.constant 256 : index
    %14 = vector.load %arg13[%c32_23, %c256_24] : memref<144x512xbf16, #tpu.memory_space<vmem>>, vector<16x128xbf16>
    tpu.vector_store %arg13[%c32_23, %c256_24], %11 {strides = array<i32>} : memref<144x512xbf16, #tpu.memory_space<vmem>>, vector<16x128xbf16>,
    %c48 = arith.constant 48 : index
    %c0_25 = arith.constant 0 : index
    %15 = vector.load %arg1[%c48, %c0_25] : memref<64x128xbf16, #tpu.memory_space<vmem>>, vector<16x128xbf16>
    %c0_26 = arith.constant 0 : index
    %c384 = arith.constant 384 : index
    %16 = vector.load %arg13[%c0_26, %c384] : memref<144x512xbf16, #tpu.memory_space<vmem>>, vector<16x128xbf16>
    tpu.vector_store %arg13[%c0_26, %c384], %15 {strides = array<i32>} : memref<144x512xbf16, #tpu.memory_space<vmem>>, vector<16x128xbf16>,
    %c16_27 = arith.constant 16 : index
    %c384_28 = arith.constant 384 : index
    %17 = vector.load %arg13[%c16_27, %c384_28] : memref<144x512xbf16, #tpu.memory_space<vmem>>, vector<16x128xbf16>
    tpu.vector_store %arg13[%c16_27, %c384_28], %15 {strides = array<i32>} : memref<144x512xbf16, #tpu.memory_space<vmem>>, vector<16x128xbf16>,
    %c32_29 = arith.constant 32 : index
    %c384_30 = arith.constant 384 : index
    %18 = vector.load %arg13[%c32_29, %c384_30] : memref<144x512xbf16, #tpu.memory_space<vmem>>, vector<16x128xbf16>
    tpu.vector_store %arg13[%c32_29, %c384_30], %15 {strides = array<i32>} : memref<144x512xbf16, #tpu.memory_space<vmem>>, vector<16x128xbf16>,
    %c0_31 = arith.constant 0 : index
    %c0_32 = arith.constant 0 : index
    %19 = vector.load %arg1[%c0_31, %c0_32] : memref<64x128xbf16, #tpu.memory_space<vmem>>, vector<64x128xbf16>
    %cst = arith.constant dense<0.000000e+00> : vector<64x128xf32>
    %20 = tpu.matmul %19, %0, %cst {dimension_numbers = #tpu.dot_dimension_numbers<[1], [0], [0], [1], [0, 0, 1, 1], [], []>} : vector<64x128xbf16>, vector<128x128xbf16>, vector<64x128xf32> -> vector<64x128xf32>
    %21 = arith.truncf %20 : vector<64x128xf32> to vector<64x128xbf16>
    %c0_33 = arith.constant 0 : index
    %c0_34 = arith.constant 0 : index
    %22 = vector.load %arg10[%c0_33, %c0_34] : memref<64x128xbf16, #tpu.memory_space<vmem>>, vector<64x128xbf16>
    tpu.vector_store %arg10[%c0_33, %c0_34], %21 {strides = array<i32>} : memref<64x128xbf16, #tpu.memory_space<vmem>>, vector<64x128xbf16>,
    %c0_35 = arith.constant 0 : index
    %c0_36 = arith.constant 0 : index
    %23 = vector.load %arg1[%c0_35, %c0_36] : memref<64x128xbf16, #tpu.memory_space<vmem>>, vector<64x128xbf16>
    %cst_37 = arith.constant dense<0.000000e+00> : vector<64x128xf32>
    %24 = tpu.matmul %23, %1, %cst_37 {dimension_numbers = #tpu.dot_dimension_numbers<[1], [0], [0], [1], [0, 0, 1, 1], [], []>} : vector<64x128xbf16>, vector<128x128xbf16>, vector<64x128xf32> -> vector<64x128xf32>
    %25 = arith.truncf %24 : vector<64x128xf32> to vector<64x128xbf16>
    %c0_38 = arith.constant 0 : index
    %c0_39 = arith.constant 0 : index
    %26 = vector.load %arg11[%c0_38, %c0_39] : memref<64x128xbf16, #tpu.memory_space<vmem>>, vector<64x128xbf16>
    tpu.vector_store %arg11[%c0_38, %c0_39], %25 {strides = array<i32>} : memref<64x128xbf16, #tpu.memory_space<vmem>>, vector<64x128xbf16>,
    %c0_40 = arith.constant 0 : index
    %c0_41 = arith.constant 0 : index
    %27 = vector.load %arg1[%c0_40, %c0_41] : memref<64x128xbf16, #tpu.memory_space<vmem>>, vector<64x128xbf16>
    %cst_42 = arith.constant dense<0.000000e+00> : vector<64x128xf32>
    %28 = tpu.matmul %27, %2, %cst_42 {dimension_numbers = #tpu.dot_dimension_numbers<[1], [0], [0], [1], [0, 0, 1, 1], [], []>} : vector<64x128xbf16>, vector<128x128xbf16>, vector<64x128xf32> -> vector<64x128xf32>
    %29 = arith.truncf %28 : vector<64x128xf32> to vector<64x128xbf16>
    %c0_43 = arith.constant 0 : index
    %c0_44 = arith.constant 0 : index
    %30 = vector.load %arg12[%c0_43, %c0_44] : memref<64x128xbf16, #tpu.memory_space<vmem>>, vector<64x128xbf16>
    tpu.vector_store %arg12[%c0_43, %c0_44], %29 {strides = array<i32>} : memref<64x128xbf16, #tpu.memory_space<vmem>>, vector<64x128xbf16>,
    %c0_45 = arith.constant 0 : index
    %c0_46 = arith.constant 0 : index
    %31 = vector.load %arg10[%c0_45, %c0_46] : memref<64x128xbf16, #tpu.memory_space<vmem>>, vector<16x128xbf16>
    %c48_47 = arith.constant 48 : index
    %c0_48 = arith.constant 0 : index
    %32 = vector.load %arg13[%c48_47, %c0_48] : memref<144x512xbf16, #tpu.memory_space<vmem>>, vector<16x128xbf16>
    tpu.vector_store %arg13[%c48_47, %c0_48], %31 {strides = array<i32>} : memref<144x512xbf16, #tpu.memory_space<vmem>>, vector<16x128xbf16>,
    %c0_49 = arith.constant 0 : index
    %c0_50 = arith.constant 0 : index
    %33 = vector.load %arg11[%c0_49, %c0_50] : memref<64x128xbf16, #tpu.memory_space<vmem>>, vector<16x128xbf16>
    %c64 = arith.constant 64 : index
    %c0_51 = arith.constant 0 : index
    %34 = vector.load %arg13[%c64, %c0_51] : memref<144x512xbf16, #tpu.memory_space<vmem>>, vector<16x128xbf16>
    tpu.vector_store %arg13[%c64, %c0_51], %33 {strides = array<i32>} : memref<144x512xbf16, #tpu.memory_space<vmem>>, vector<16x128xbf16>,
    %c0_52 = arith.constant 0 : index
    %c0_53 = arith.constant 0 : index
    %35 = vector.load %arg12[%c0_52, %c0_53] : memref<64x128xbf16, #tpu.memory_space<vmem>>, vector<16x128xbf16>
    %c80 = arith.constant 80 : index
    %c0_54 = arith.constant 0 : index
    %36 = vector.load %arg13[%c80, %c0_54] : memref<144x512xbf16, #tpu.memory_space<vmem>>, vector<16x128xbf16>
    tpu.vector_store %arg13[%c80, %c0_54], %35 {strides = array<i32>} : memref<144x512xbf16, #tpu.memory_space<vmem>>, vector<16x128xbf16>,
    %c16_55 = arith.constant 16 : index
    %c0_56 = arith.constant 0 : index
    %37 = vector.load %arg10[%c16_55, %c0_56] : memref<64x128xbf16, #tpu.memory_space<vmem>>, vector<16x128xbf16>
    %c48_57 = arith.constant 48 : index
    %c128_58 = arith.constant 128 : index
    %38 = vector.load %arg13[%c48_57, %c128_58] : memref<144x512xbf16, #tpu.memory_space<vmem>>, vector<16x128xbf16>
    tpu.vector_store %arg13[%c48_57, %c128_58], %37 {strides = array<i32>} : memref<144x512xbf16, #tpu.memory_space<vmem>>, vector<16x128xbf16>,
    %c16_59 = arith.constant 16 : index
    %c0_60 = arith.constant 0 : index
    %39 = vector.load %arg11[%c16_59, %c0_60] : memref<64x128xbf16, #tpu.memory_space<vmem>>, vector<16x128xbf16>
    %c64_61 = arith.constant 64 : index
    %c128_62 = arith.constant 128 : index
    %40 = vector.load %arg13[%c64_61, %c128_62] : memref<144x512xbf16, #tpu.memory_space<vmem>>, vector<16x128xbf16>
    tpu.vector_store %arg13[%c64_61, %c128_62], %39 {strides = array<i32>} : memref<144x512xbf16, #tpu.memory_space<vmem>>, vector<16x128xbf16>,
    %c16_63 = arith.constant 16 : index
    %c0_64 = arith.constant 0 : index
    %41 = vector.load %arg12[%c16_63, %c0_64] : memref<64x128xbf16, #tpu.memory_space<vmem>>, vector<16x128xbf16>
    %c80_65 = arith.constant 80 : index
    %c128_66 = arith.constant 128 : index
    %42 = vector.load %arg13[%c80_65, %c128_66] : memref<144x512xbf16, #tpu.memory_space<vmem>>, vector<16x128xbf16>
    tpu.vector_store %arg13[%c80_65, %c128_66], %41 {strides = array<i32>} : memref<144x512xbf16, #tpu.memory_space<vmem>>, vector<16x128xbf16>,
    %c32_67 = arith.constant 32 : index
    %c0_68 = arith.constant 0 : index
    %43 = vector.load %arg10[%c32_67, %c0_68] : memref<64x128xbf16, #tpu.memory_space<vmem>>, vector<16x128xbf16>
    %c48_69 = arith.constant 48 : index
    %c256_70 = arith.constant 256 : index
    %44 = vector.load %arg13[%c48_69, %c256_70] : memref<144x512xbf16, #tpu.memory_space<vmem>>, vector<16x128xbf16>
    tpu.vector_store %arg13[%c48_69, %c256_70], %43 {strides = array<i32>} : memref<144x512xbf16, #tpu.memory_space<vmem>>, vector<16x128xbf16>,
    %c32_71 = arith.constant 32 : index
    %c0_72 = arith.constant 0 : index
    %45 = vector.load %arg11[%c32_71, %c0_72] : memref<64x128xbf16, #tpu.memory_space<vmem>>, vector<16x128xbf16>
    %c64_73 = arith.constant 64 : index
    %c256_74 = arith.constant 256 : index
    %46 = vector.load %arg13[%c64_73, %c256_74] : memref<144x512xbf16, #tpu.memory_space<vmem>>, vector<16x128xbf16>
    tpu.vector_store %arg13[%c64_73, %c256_74], %45 {strides = array<i32>} : memref<144x512xbf16, #tpu.memory_space<vmem>>, vector<16x128xbf16>,
    %c32_75 = arith.constant 32 : index
    %c0_76 = arith.constant 0 : index
    %47 = vector.load %arg12[%c32_75, %c0_76] : memref<64x128xbf16, #tpu.memory_space<vmem>>, vector<16x128xbf16>
    %c80_77 = arith.constant 80 : index
    %c256_78 = arith.constant 256 : index
    %48 = vector.load %arg13[%c80_77, %c256_78] : memref<144x512xbf16, #tpu.memory_space<vmem>>, vector<16x128xbf16>
    tpu.vector_store %arg13[%c80_77, %c256_78], %47 {strides = array<i32>} : memref<144x512xbf16, #tpu.memory_space<vmem>>, vector<16x128xbf16>,
    %c48_79 = arith.constant 48 : index
    %c0_80 = arith.constant 0 : index
    %49 = vector.load %arg10[%c48_79, %c0_80] : memref<64x128xbf16, #tpu.memory_space<vmem>>, vector<16x128xbf16>
    %c48_81 = arith.constant 48 : index
    %c384_82 = arith.constant 384 : index
    %50 = vector.load %arg13[%c48_81, %c384_82] : memref<144x512xbf16, #tpu.memory_space<vmem>>, vector<16x128xbf16>
    tpu.vector_store %arg13[%c48_81, %c384_82], %49 {strides = array<i32>} : memref<144x512xbf16, #tpu.memory_space<vmem>>, vector<16x128xbf16>,
    %c48_83 = arith.constant 48 : index
    %c0_84 = arith.constant 0 : index
    %51 = vector.load %arg11[%c48_83, %c0_84] : memref<64x128xbf16, #tpu.memory_space<vmem>>, vector<16x128xbf16>
    %c64_85 = arith.constant 64 : index
    %c384_86 = arith.constant 384 : index
    %52 = vector.load %arg13[%c64_85, %c384_86] : memref<144x512xbf16, #tpu.memory_space<vmem>>, vector<16x128xbf16>
    tpu.vector_store %arg13[%c64_85, %c384_86], %51 {strides = array<i32>} : memref<144x512xbf16, #tpu.memory_space<vmem>>, vector<16x128xbf16>,
    %c48_87 = arith.constant 48 : index
    %c0_88 = arith.constant 0 : index
    %53 = vector.load %arg12[%c48_87, %c0_88] : memref<64x128xbf16, #tpu.memory_space<vmem>>, vector<16x128xbf16>
    %c80_89 = arith.constant 80 : index
    %c384_90 = arith.constant 384 : index
    %54 = vector.load %arg13[%c80_89, %c384_90] : memref<144x512xbf16, #tpu.memory_space<vmem>>, vector<16x128xbf16>
    tpu.vector_store %arg13[%c80_89, %c384_90], %53 {strides = array<i32>} : memref<144x512xbf16, #tpu.memory_space<vmem>>, vector<16x128xbf16>,
    %c0_91 = arith.constant 0 : index
    %c0_92 = arith.constant 0 : index
    %55 = vector.load %arg10[%c0_91, %c0_92] : memref<64x128xbf16, #tpu.memory_space<vmem>>, vector<64x128xbf16>
    %cst_93 = arith.constant dense<0.000000e+00> : vector<64x128xf32>
    %56 = tpu.matmul %55, %0, %cst_93 {dimension_numbers = #tpu.dot_dimension_numbers<[1], [0], [0], [1], [0, 0, 1, 1], [], []>} : vector<64x128xbf16>, vector<128x128xbf16>, vector<64x128xf32> -> vector<64x128xf32>
    %57 = arith.truncf %56 : vector<64x128xf32> to vector<64x128xbf16>
    %c0_94 = arith.constant 0 : index
    %c0_95 = arith.constant 0 : index
    %58 = vector.load %arg10[%c0_94, %c0_95] : memref<64x128xbf16, #tpu.memory_space<vmem>>, vector<64x128xbf16>
    tpu.vector_store %arg10[%c0_94, %c0_95], %57 {strides = array<i32>} : memref<64x128xbf16, #tpu.memory_space<vmem>>, vector<64x128xbf16>,
    %c0_96 = arith.constant 0 : index
    %c0_97 = arith.constant 0 : index
    %59 = vector.load %arg11[%c0_96, %c0_97] : memref<64x128xbf16, #tpu.memory_space<vmem>>, vector<64x128xbf16>
    %cst_98 = arith.constant dense<0.000000e+00> : vector<64x128xf32>
    %60 = tpu.matmul %59, %1, %cst_98 {dimension_numbers = #tpu.dot_dimension_numbers<[1], [0], [0], [1], [0, 0, 1, 1], [], []>} : vector<64x128xbf16>, vector<128x128xbf16>, vector<64x128xf32> -> vector<64x128xf32>
    %61 = arith.truncf %60 : vector<64x128xf32> to vector<64x128xbf16>
    %c0_99 = arith.constant 0 : index
    %c0_100 = arith.constant 0 : index
    %62 = vector.load %arg11[%c0_99, %c0_100] : memref<64x128xbf16, #tpu.memory_space<vmem>>, vector<64x128xbf16>
    tpu.vector_store %arg11[%c0_99, %c0_100], %61 {strides = array<i32>} : memref<64x128xbf16, #tpu.memory_space<vmem>>, vector<64x128xbf16>,
    %c0_101 = arith.constant 0 : index
    %c0_102 = arith.constant 0 : index
    %63 = vector.load %arg12[%c0_101, %c0_102] : memref<64x128xbf16, #tpu.memory_space<vmem>>, vector<64x128xbf16>
    %cst_103 = arith.constant dense<0.000000e+00> : vector<64x128xf32>
    %64 = tpu.matmul %63, %2, %cst_103 {dimension_numbers = #tpu.dot_dimension_numbers<[1], [0], [0], [1], [0, 0, 1, 1], [], []>} : vector<64x128xbf16>, vector<128x128xbf16>, vector<64x128xf32> -> vector<64x128xf32>
    %65 = arith.truncf %64 : vector<64x128xf32> to vector<64x128xbf16>
    %c0_104 = arith.constant 0 : index
    %c0_105 = arith.constant 0 : index
    %66 = vector.load %arg12[%c0_104, %c0_105] : memref<64x128xbf16, #tpu.memory_space<vmem>>, vector<64x128xbf16>
    tpu.vector_store %arg12[%c0_104, %c0_105], %65 {strides = array<i32>} : memref<64x128xbf16, #tpu.memory_space<vmem>>, vector<64x128xbf16>,
    %c0_106 = arith.constant 0 : index
    %c0_107 = arith.constant 0 : index
    %67 = vector.load %arg10[%c0_106, %c0_107] : memref<64x128xbf16, #tpu.memory_space<vmem>>, vector<16x128xbf16>
    %c96 = arith.constant 96 : index
    %c0_108 = arith.constant 0 : index
    %68 = vector.load %arg13[%c96, %c0_108] : memref<144x512xbf16, #tpu.memory_space<vmem>>, vector<16x128xbf16>
    tpu.vector_store %arg13[%c96, %c0_108], %67 {strides = array<i32>} : memref<144x512xbf16, #tpu.memory_space<vmem>>, vector<16x128xbf16>,
    %c0_109 = arith.constant 0 : index
    %c0_110 = arith.constant 0 : index
    %69 = vector.load %arg11[%c0_109, %c0_110] : memref<64x128xbf16, #tpu.memory_space<vmem>>, vector<16x128xbf16>
    %c112 = arith.constant 112 : index
    %c0_111 = arith.constant 0 : index
    %70 = vector.load %arg13[%c112, %c0_111] : memref<144x512xbf16, #tpu.memory_space<vmem>>, vector<16x128xbf16>
    tpu.vector_store %arg13[%c112, %c0_111], %69 {strides = array<i32>} : memref<144x512xbf16, #tpu.memory_space<vmem>>, vector<16x128xbf16>,
    %c0_112 = arith.constant 0 : index
    %c0_113 = arith.constant 0 : index
    %71 = vector.load %arg12[%c0_112, %c0_113] : memref<64x128xbf16, #tpu.memory_space<vmem>>, vector<16x128xbf16>
    %c128_114 = arith.constant 128 : index
    %c0_115 = arith.constant 0 : index
    %72 = vector.load %arg13[%c128_114, %c0_115] : memref<144x512xbf16, #tpu.memory_space<vmem>>, vector<16x128xbf16>
    tpu.vector_store %arg13[%c128_114, %c0_115], %71 {strides = array<i32>} : memref<144x512xbf16, #tpu.memory_space<vmem>>, vector<16x128xbf16>,
    %c16_116 = arith.constant 16 : index
    %c0_117 = arith.constant 0 : index
    %73 = vector.load %arg10[%c16_116, %c0_117] : memref<64x128xbf16, #tpu.memory_space<vmem>>, vector<16x128xbf16>
    %c96_118 = arith.constant 96 : index
    %c128_119 = arith.constant 128 : index
    %74 = vector.load %arg13[%c96_118, %c128_119] : memref<144x512xbf16, #tpu.memory_space<vmem>>, vector<16x128xbf16>
    tpu.vector_store %arg13[%c96_118, %c128_119], %73 {strides = array<i32>} : memref<144x512xbf16, #tpu.memory_space<vmem>>, vector<16x128xbf16>,
    %c16_120 = arith.constant 16 : index
    %c0_121 = arith.constant 0 : index
    %75 = vector.load %arg11[%c16_120, %c0_121] : memref<64x128xbf16, #tpu.memory_space<vmem>>, vector<16x128xbf16>
    %c112_122 = arith.constant 112 : index
    %c128_123 = arith.constant 128 : index
    %76 = vector.load %arg13[%c112_122, %c128_123] : memref<144x512xbf16, #tpu.memory_space<vmem>>, vector<16x128xbf16>
    tpu.vector_store %arg13[%c112_122, %c128_123], %75 {strides = array<i32>} : memref<144x512xbf16, #tpu.memory_space<vmem>>, vector<16x128xbf16>,
    %c16_124 = arith.constant 16 : index
    %c0_125 = arith.constant 0 : index
    %77 = vector.load %arg12[%c16_124, %c0_125] : memref<64x128xbf16, #tpu.memory_space<vmem>>, vector<16x128xbf16>
    %c128_126 = arith.constant 128 : index
    %c128_127 = arith.constant 128 : index
    %78 = vector.load %arg13[%c128_126, %c128_127] : memref<144x512xbf16, #tpu.memory_space<vmem>>, vector<16x128xbf16>
    tpu.vector_store %arg13[%c128_126, %c128_127], %77 {strides = array<i32>} : memref<144x512xbf16, #tpu.memory_space<vmem>>, vector<16x128xbf16>,
    %c32_128 = arith.constant 32 : index
    %c0_129 = arith.constant 0 : index
    %79 = vector.load %arg10[%c32_128, %c0_129] : memref<64x128xbf16, #tpu.memory_space<vmem>>, vector<16x128xbf16>
    %c96_130 = arith.constant 96 : index
    %c256_131 = arith.constant 256 : index
    %80 = vector.load %arg13[%c96_130, %c256_131] : memref<144x512xbf16, #tpu.memory_space<vmem>>, vector<16x128xbf16>
    tpu.vector_store %arg13[%c96_130, %c256_131], %79 {strides = array<i32>} : memref<144x512xbf16, #tpu.memory_space<vmem>>, vector<16x128xbf16>,
    %c32_132 = arith.constant 32 : index
    %c0_133 = arith.constant 0 : index
    %81 = vector.load %arg11[%c32_132, %c0_133] : memref<64x128xbf16, #tpu.memory_space<vmem>>, vector<16x128xbf16>
    %c112_134 = arith.constant 112 : index
    %c256_135 = arith.constant 256 : index
    %82 = vector.load %arg13[%c112_134, %c256_135] : memref<144x512xbf16, #tpu.memory_space<vmem>>, vector<16x128xbf16>
    tpu.vector_store %arg13[%c112_134, %c256_135], %81 {strides = array<i32>} : memref<144x512xbf16, #tpu.memory_space<vmem>>, vector<16x128xbf16>,
    %c32_136 = arith.constant 32 : index
    %c0_137 = arith.constant 0 : index
    %83 = vector.load %arg12[%c32_136, %c0_137] : memref<64x128xbf16, #tpu.memory_space<vmem>>, vector<16x128xbf16>
    %c128_138 = arith.constant 128 : index
    %c256_139 = arith.constant 256 : index
    %84 = vector.load %arg13[%c128_138, %c256_139] : memref<144x512xbf16, #tpu.memory_space<vmem>>, vector<16x128xbf16>
    tpu.vector_store %arg13[%c128_138, %c256_139], %83 {strides = array<i32>} : memref<144x512xbf16, #tpu.memory_space<vmem>>, vector<16x128xbf16>,
    %c48_140 = arith.constant 48 : index
    %c0_141 = arith.constant 0 : index
    %85 = vector.load %arg10[%c48_140, %c0_141] : memref<64x128xbf16, #tpu.memory_space<vmem>>, vector<16x128xbf16>
    %c96_142 = arith.constant 96 : index
    %c384_143 = arith.constant 384 : index
    %86 = vector.load %arg13[%c96_142, %c384_143] : memref<144x512xbf16, #tpu.memory_space<vmem>>, vector<16x128xbf16>
    tpu.vector_store %arg13[%c96_142, %c384_143], %85 {strides = array<i32>} : memref<144x512xbf16, #tpu.memory_space<vmem>>, vector<16x128xbf16>,
    %c48_144 = arith.constant 48 : index
    %c0_145 = arith.constant 0 : index
    %87 = vector.load %arg11[%c48_144, %c0_145] : memref<64x128xbf16, #tpu.memory_space<vmem>>, vector<16x128xbf16>
    %c112_146 = arith.constant 112 : index
    %c384_147 = arith.constant 384 : index
    %88 = vector.load %arg13[%c112_146, %c384_147] : memref<144x512xbf16, #tpu.memory_space<vmem>>, vector<16x128xbf16>
    tpu.vector_store %arg13[%c112_146, %c384_147], %87 {strides = array<i32>} : memref<144x512xbf16, #tpu.memory_space<vmem>>, vector<16x128xbf16>,
    %c48_148 = arith.constant 48 : index
    %c0_149 = arith.constant 0 : index
    %89 = vector.load %arg12[%c48_148, %c0_149] : memref<64x128xbf16, #tpu.memory_space<vmem>>, vector<16x128xbf16>
    %c128_150 = arith.constant 128 : index
    %c384_151 = arith.constant 384 : index
    %90 = vector.load %arg13[%c128_150, %c384_151] : memref<144x512xbf16, #tpu.memory_space<vmem>>, vector<16x128xbf16>
    tpu.vector_store %arg13[%c128_150, %c384_151], %89 {strides = array<i32>} : memref<144x512xbf16, #tpu.memory_space<vmem>>, vector<16x128xbf16>,
    %c0_152 = arith.constant 0 : index
    %c0_153 = arith.constant 0 : index
    %91 = vector.load %arg5[%c0_152, %c0_153] : memref<8x144xbf16, #tpu.memory_space<vmem>>, vector<8x144xbf16>
    %c0_154 = arith.constant 0 : index
    %c0_155 = arith.constant 0 : index
    %92 = vector.load %arg13[%c0_154, %c0_155] : memref<144x512xbf16, #tpu.memory_space<vmem>>, vector<144x512xbf16>
    %cst_156 = arith.constant dense<0.000000e+00> : vector<8x512xf32>
    %93 = tpu.matmul %91, %92, %cst_156 {dimension_numbers = #tpu.dot_dimension_numbers<[1], [0], [0], [1], [0, 0, 1, 1], [], []>} : vector<8x144xbf16>, vector<144x512xbf16>, vector<8x512xf32> -> vector<8x512xf32>
    %c0_157 = arith.constant 0 : index
    %c0_158 = arith.constant 0 : index
    %94 = vector.load %arg6[%c0_157, %c0_158] : memref<8x1xf32, #tpu.memory_space<vmem>>, vector<8x1xf32>
    %95 = vector.broadcast %94 : vector<8x1xf32> to vector<8x512xf32>
    %96 = arith.addf %93, %95 : vector<8x512xf32>
    %cst_159 = arith.constant 0.000000e+00 : f32
    %97 = vector.broadcast %cst_159 : f32 to vector<8x512xf32>
    %98 = arith.maximumf %96, %97 : vector<8x512xf32>
    %99 = math.tanh %98 : vector<8x512xf32>
    %100 = vector.extract_strided_slice %99 {offsets = [0, 0], sizes = [8, 128], strides = [1, 1]} : vector<8x512xf32> to vector<8x128xf32>
    %c0_160 = arith.constant 0 : index
    %c0_161 = arith.constant 0 : index
    %c0_162 = arith.constant 0 : index
    %101 = vector.load %arg7[%c0_160, %c0_161, %c0_162] : memref<4x8x128xf32, #tpu.memory_space<vmem>>, vector<1x8x128xf32>
    %102 = vector.shape_cast %101 : vector<1x8x128xf32> to vector<8x128xf32>
    %c0_163 = arith.constant 0 : index
    %c0_164 = arith.constant 0 : index
    %c0_165 = arith.constant 0 : index
    %103 = vector.load %arg8[%c0_163, %c0_164, %c0_165] : memref<4x8x128xf32, #tpu.memory_space<vmem>>, vector<1x8x128xf32>
    %104 = vector.shape_cast %103 : vector<1x8x128xf32> to vector<8x128xf32>
    %105 = arith.mulf %102, %104 : vector<8x128xf32>
    %cst_166 = arith.constant 1.000000e+00 : f32
    %106 = vector.broadcast %cst_166 : f32 to vector<8x128xf32>
    %107 = arith.subf %106, %102 : vector<8x128xf32>
    %108 = arith.mulf %107, %100 : vector<8x128xf32>
    %109 = arith.addf %105, %108 : vector<8x128xf32>
    %c0_167 = arith.constant 0 : index
    %c0_168 = arith.constant 0 : index
    %c0_169 = arith.constant 0 : index
    %110 = vector.load %arg9[%c0_167, %c0_168, %c0_169] : memref<4x8x128xf32, #tpu.memory_space<vmem>>, vector<1x8x128xf32>
    %111 = vector.shape_cast %110 : vector<1x8x128xf32> to vector<8x128xf32>
    %112 = vector.shape_cast %109 : vector<8x128xf32> to vector<1x8x128xf32>
    tpu.vector_store %arg9[%c0_167, %c0_168, %c0_169], %112 {strides = array<i32>} : memref<4x8x128xf32, #tpu.memory_space<vmem>>, vector<1x8x128xf32>,
    %113 = vector.extract_strided_slice %99 {offsets = [0, 128], sizes = [8, 128], strides = [1, 1]} : vector<8x512xf32> to vector<8x128xf32>
    %c1 = arith.constant 1 : index
    %c0_170 = arith.constant 0 : index
    %c0_171 = arith.constant 0 : index
    %114 = vector.load %arg7[%c1, %c0_170, %c0_171] : memref<4x8x128xf32, #tpu.memory_space<vmem>>, vector<1x8x128xf32>
    %115 = vector.shape_cast %114 : vector<1x8x128xf32> to vector<8x128xf32>
    %c1_172 = arith.constant 1 : index
    %c0_173 = arith.constant 0 : index
    %c0_174 = arith.constant 0 : index
    %116 = vector.load %arg8[%c1_172, %c0_173, %c0_174] : memref<4x8x128xf32, #tpu.memory_space<vmem>>, vector<1x8x128xf32>
    %117 = vector.shape_cast %116 : vector<1x8x128xf32> to vector<8x128xf32>
    %118 = arith.mulf %115, %117 : vector<8x128xf32>
    %cst_175 = arith.constant 1.000000e+00 : f32
    %119 = vector.broadcast %cst_175 : f32 to vector<8x128xf32>
    %120 = arith.subf %119, %115 : vector<8x128xf32>
    %121 = arith.mulf %120, %113 : vector<8x128xf32>
    %122 = arith.addf %118, %121 : vector<8x128xf32>
    %c1_176 = arith.constant 1 : index
    %c0_177 = arith.constant 0 : index
    %c0_178 = arith.constant 0 : index
    %123 = vector.load %arg9[%c1_176, %c0_177, %c0_178] : memref<4x8x128xf32, #tpu.memory_space<vmem>>, vector<1x8x128xf32>
    %124 = vector.shape_cast %123 : vector<1x8x128xf32> to vector<8x128xf32>
    %125 = vector.shape_cast %122 : vector<8x128xf32> to vector<1x8x128xf32>
    tpu.vector_store %arg9[%c1_176, %c0_177, %c0_178], %125 {strides = array<i32>} : memref<4x8x128xf32, #tpu.memory_space<vmem>>, vector<1x8x128xf32>,
    %126 = vector.extract_strided_slice %99 {offsets = [0, 256], sizes = [8, 128], strides = [1, 1]} : vector<8x512xf32> to vector<8x128xf32>
    %c2 = arith.constant 2 : index
    %c0_179 = arith.constant 0 : index
    %c0_180 = arith.constant 0 : index
    %127 = vector.load %arg7[%c2, %c0_179, %c0_180] : memref<4x8x128xf32, #tpu.memory_space<vmem>>, vector<1x8x128xf32>
    %128 = vector.shape_cast %127 : vector<1x8x128xf32> to vector<8x128xf32>
    %c2_181 = arith.constant 2 : index
    %c0_182 = arith.constant 0 : index
    %c0_183 = arith.constant 0 : index
    %129 = vector.load %arg8[%c2_181, %c0_182, %c0_183] : memref<4x8x128xf32, #tpu.memory_space<vmem>>, vector<1x8x128xf32>
    %130 = vector.shape_cast %129 : vector<1x8x128xf32> to vector<8x128xf32>
    %131 = arith.mulf %128, %130 : vector<8x128xf32>
    %cst_184 = arith.constant 1.000000e+00 : f32
    %132 = vector.broadcast %cst_184 : f32 to vector<8x128xf32>
    %133 = arith.subf %132, %128 : vector<8x128xf32>
    %134 = arith.mulf %133, %126 : vector<8x128xf32>
    %135 = arith.addf %131, %134 : vector<8x128xf32>
    %c2_185 = arith.constant 2 : index
    %c0_186 = arith.constant 0 : index
    %c0_187 = arith.constant 0 : index
    %136 = vector.load %arg9[%c2_185, %c0_186, %c0_187] : memref<4x8x128xf32, #tpu.memory_space<vmem>>, vector<1x8x128xf32>
    %137 = vector.shape_cast %136 : vector<1x8x128xf32> to vector<8x128xf32>
    %138 = vector.shape_cast %135 : vector<8x128xf32> to vector<1x8x128xf32>
    tpu.vector_store %arg9[%c2_185, %c0_186, %c0_187], %138 {strides = array<i32>} : memref<4x8x128xf32, #tpu.memory_space<vmem>>, vector<1x8x128xf32>,
    %139 = vector.extract_strided_slice %99 {offsets = [0, 384], sizes = [8, 128], strides = [1, 1]} : vector<8x512xf32> to vector<8x128xf32>
    %c3 = arith.constant 3 : index
    %c0_188 = arith.constant 0 : index
    %c0_189 = arith.constant 0 : index
    %140 = vector.load %arg7[%c3, %c0_188, %c0_189] : memref<4x8x128xf32, #tpu.memory_space<vmem>>, vector<1x8x128xf32>
    %141 = vector.shape_cast %140 : vector<1x8x128xf32> to vector<8x128xf32>
    %c3_190 = arith.constant 3 : index
    %c0_191 = arith.constant 0 : index
    %c0_192 = arith.constant 0 : index
    %142 = vector.load %arg8[%c3_190, %c0_191, %c0_192] : memref<4x8x128xf32, #tpu.memory_space<vmem>>, vector<1x8x128xf32>
    %143 = vector.shape_cast %142 : vector<1x8x128xf32> to vector<8x128xf32>
    %144 = arith.mulf %141, %143 : vector<8x128xf32>
    %cst_193 = arith.constant 1.000000e+00 : f32
    %145 = vector.broadcast %cst_193 : f32 to vector<8x128xf32>
    %146 = arith.subf %145, %141 : vector<8x128xf32>
    %147 = arith.mulf %146, %139 : vector<8x128xf32>
    %148 = arith.addf %144, %147 : vector<8x128xf32>
    %c3_194 = arith.constant 3 : index
    %c0_195 = arith.constant 0 : index
    %c0_196 = arith.constant 0 : index
    %149 = vector.load %arg9[%c3_194, %c0_195, %c0_196] : memref<4x8x128xf32, #tpu.memory_space<vmem>>, vector<1x8x128xf32>
    %150 = vector.shape_cast %149 : vector<1x8x128xf32> to vector<8x128xf32>
    %151 = vector.shape_cast %148 : vector<8x128xf32> to vector<1x8x128xf32>
    tpu.vector_store %arg9[%c3_194, %c0_195, %c0_196], %151 {strides = array<i32>} : memref<4x8x128xf32, #tpu.memory_space<vmem>>, vector<1x8x128xf32>,
    return
  }
  func.func @transform_0(%arg0: i32) -> (i32, i32) {
    %c0_i32 = arith.constant 0 : i32
    %c0_i32_0 = arith.constant 0 : i32
    return %arg0, %c0_i32 : i32, i32
  }
  func.func @transform_1(%arg0: i32) -> (i32, i32) {
    %c0_i32 = arith.constant 0 : i32
    %c0_i32_0 = arith.constant 0 : i32
    %c0_i32_1 = arith.constant 0 : i32
    return %c0_i32, %c0_i32_0 : i32, i32
  }
  func.func @transform_2(%arg0: i32) -> (i32, i32) {
    %c0_i32 = arith.constant 0 : i32
    %c0_i32_0 = arith.constant 0 : i32
    %c0_i32_1 = arith.constant 0 : i32
    return %c0_i32, %c0_i32_0 : i32, i32
  }
  func.func @transform_3(%arg0: i32) -> (i32, i32) {
    %c0_i32 = arith.constant 0 : i32
    %c0_i32_0 = arith.constant 0 : i32
    %c0_i32_1 = arith.constant 0 : i32
    return %c0_i32, %c0_i32_0 : i32, i32
  }
  func.func @transform_4(%arg0: i32) -> (i32, i32) {
    %c0_i32 = arith.constant 0 : i32
    %c0_i32_0 = arith.constant 0 : i32
    %c0_i32_1 = arith.constant 0 : i32
    return %c0_i32, %c0_i32_0 : i32, i32
  }
  func.func @transform_5(%arg0: i32) -> (i32, i32) {
    %c0_i32 = arith.constant 0 : i32
    %c0_i32_0 = arith.constant 0 : i32
    %c0_i32_1 = arith.constant 0 : i32
    return %c0_i32, %c0_i32_0 : i32, i32
  }
  func.func @transform_6(%arg0: i32) -> (i32, i32, i32) {
    %c0_i32 = arith.constant 0 : i32
    %c0_i32_0 = arith.constant 0 : i32
    %c0_i32_1 = arith.constant 0 : i32
    return %arg0, %c0_i32, %c0_i32_0 : i32, i32, i32
  }
  func.func @transform_7(%arg0: i32) -> (i32, i32, i32) {
    %c0_i32 = arith.constant 0 : i32
    %c0_i32_0 = arith.constant 0 : i32
    %c0_i32_1 = arith.constant 0 : i32
    return %arg0, %c0_i32, %c0_i32_0 : i32, i32, i32
  }
  func.func @transform_8(%arg0: i32) -> (i32, i32, i32) {
    %c0_i32 = arith.constant 0 : i32
    %c0_i32_0 = arith.constant 0 : i32
    %c0_i32_1 = arith.constant 0 : i32
    return %arg0, %c0_i32, %c0_i32_0 : i32, i32, i32
  }
}

</mosaic_0001>

<bundles_post_ra>
// kernel: dlgnn_cell_forward.2
= control target key start
LH: loop header
LB: loop body
LE: loop exit
PB: predicated region body
PF: predicated region fallthrough
CT: control target
= control target key end

     0   :  { %s1778_s21 = smov 0   ;;  %s2045_s0 = inlined_call_operand.vmem [shape: bf16[128,128], index: 0, kind: input, shape index: {}]   ;;  %s2046_s1 = inlined_call_operand.vmem [shape: bf16[128,128], index: 1, kind: input, shape index: {}]   ;;  %s2047_s2 = inlined_call_operand.vmem [shape: bf16[128,128], index: 2, kind: input, shape index: {}]   ;;  %s2048_s3 = inlined_call_operand.vmem [shape: bf16[128,128], index: 3, kind: input, shape index: {}]   ;;  %s2049_s4 = inlined_call_operand.vmem [shape: bf16[16,144], index: 4, kind: input, shape index: {}]   ;;  %s2050_s5 = inlined_call_operand.vmem [shape: f32[16,1], index: 5, kind: input, shape index: {}]   ;;  %s2051_s6 = inlined_call_operand.vmem [shape: f32[8,16,128], index: 6, kind: output, shape index: {}]  }
   0x1 LB: > { %s1362_s22 = sadd.s32 4294967295, %s1740_s21   ;;  %p1366_p0 = scmp.ge.s32.totalorder %s1740_s21, 1  ;;  %s1740_s21 = sphi %s1778_s21, %s16_s21  }
   0x2   : > { %p213_p1 = scmp.lt.s32.totalorder %s1740_s21, 3 }
   0x4   : > { %p214_p2 = pnand %p1366_p0, %p213_p1 }
   0x5   : > { %v1789_v0 = vld [vmem:[%s2046_s1] sm:$0xff] (!%p214_p2)   ;;  %s1367_s25 = sshll.u32 (!%p214_p2), %s1362_s22, 3  ;;  %v1802_v2 = vld [vmem:[%s2046_s1 + $0x8] sm:$0xff] (!%p214_p2)   ;;  %v1816_v4 = vld [vmem:[%s2046_s1 + $0x10] sm:$0xff] (!%p214_p2)   ;;  %vm1147_vm0 = vcmask (!%p214_p2), 130048  }
   0x6   : > { %217 = sbr.rel (%p214_p2) target bundleno = 762 (0x2fa), region = 44  ;;  %v1796_v1 = vld [vmem:[%s2047_s2] sm:$0xff] (!%p214_p2)   ;;  %1505 = vmatprep.subr.bf16.mxu0 (!%p214_p2), %v1789_v0  ;;  %p245_p3 = scmp.lt.s32.totalorder (!%p214_p2), %s1367_s25, 15  ;;  %v1809_v3 = vld [vmem:[%s2047_s2 + $0x8] sm:$0xff] (!%p214_p2)   ;;  %v1822_v5 = vld [vmem:[%s2047_s2 + $0x10] sm:$0xff] (!%p214_p2)  }
   0x7   : > { %1529 = vmatprep.subr.bf16.mxu1 (!%p214_p2), %v1796_v1  ;;  %1506 = vmatpush3.bf16.msra.mxu0 (!%p214_p2), %v1789_v0  ;;  %v1830_v6 = vld [vmem:[%s2046_s1 + $0x18] sm:$0xff] (!%p214_p2)   ;;  %v1844_v8 = vld [vmem:[%s2046_s1 + $0x20] sm:$0xff] (!%p214_p2)   ;;  %v1860_v10 = vld [vmem:[%s2046_s1 + $0x28] sm:$0xff] (!%p214_p2)  }
   0x8   : > { %1530 = vmatpush3.bf16.msra.mxu1 (!%p214_p2), %v1796_v1  ;;  %1507 = vmatprep.subr.bf16.mxu0 (!%p214_p2), %v1802_v2  ;;  %v1836_v7 = vld [vmem:[%s2047_s2 + $0x18] sm:$0xff] (!%p214_p2)   ;;  %v1850_v9 = vld [vmem:[%s2047_s2 + $0x20] sm:$0xff] (!%p214_p2)   ;;  %v1866_v11 = vld [vmem:[%s2047_s2 + $0x28] sm:$0xff] (!%p214_p2)  }
   0x9   : > { %1531 = vmatprep.subr.bf16.mxu1 (!%p214_p2), %v1809_v3  ;;  %v1879_v14 = vld [vmem:[%s2046_s1 + $0x30] sm:$0xff] (!%p214_p2)   ;;  %v1893_v16 = vld [vmem:[%s2046_s1 + $0x38] sm:$0xff] (!%p214_p2)   ;;  %v1907_v18 = vld [vmem:[%s2048_s3] sm:$0xff] (!%p214_p2)  }
   0xa   : > { %v1885_v15 = vld [vmem:[%s2047_s2 + $0x30] sm:$0xff] (!%p214_p2)   ;;  %v1899_v17 = vld [vmem:[%s2047_s2 + $0x38] sm:$0xff] (!%p214_p2)   ;;  %v1916_v21 = vld [vmem:[%s2048_s3 + $0x8] sm:$0xff] (!%p214_p2)  }
   0xb   : > { %1508 = vmatpush3.bf16.msra.mxu0 (!%p214_p2), %v1802_v2  ;;  %v1927_v24 = vld [vmem:[%s2048_s3 + $0x10] sm:$0xff] (!%p214_p2)   ;;  %v1939_v27 = vld [vmem:[%s2048_s3 + $0x18] sm:$0xff] (!%p214_p2)   ;;  %v1949_v29 = vld [vmem:[%s2048_s3 + $0x20] sm:$0xff] (!%p214_p2)  }
   0xc   : > { %1532 = vmatpush3.bf16.msra.mxu1 (!%p214_p2), %v1809_v3  ;;  %1509 = vmatprep.subr.bf16.mxu0 (!%p214_p2), %v1816_v4  ;;  %v1958_v30 = vld [vmem:[%s2048_s3 + $0x28] sm:$0xff] (!%p214_p2)   ;;  %v1967_v31 = vld [vmem:[%s2048_s3 + $0x30] sm:$0xff] (!%p214_p2)   ;;  %v1976_v32 = vld [vmem:[%s2048_s3 + $0x38] sm:$0xff] (!%p214_p2)  }
   0xd   : > { %s2053_s25 = smov (!%p245_p3, %s1367_s25), 15  ;;  %1533 = vmatprep.subr.bf16.mxu1 %v1822_v5 }
   0xe   : > { %s1368_s16 = sshll.u32 %s2053_s25, 2 }
   0xf   : > { %1510 = vmatpush3.bf16.msra.mxu0 %v1816_v4  ;;  %s1855_s25 = scalar_lea.vmem %s2045_s0, %s1368_s16  ;;  %s1369_s16 = sshll.u32 %s1362_s22, 2 }
  0x10   : > { %1534 = vmatpush3.bf16.msra.mxu1 %v1822_v5  ;;  %1511 = vmatprep.subr.bf16.mxu0 %v1830_v6  ;;  %v1675_v12 = vld [vmem:[%s1855_s25] sm:$0xff]   ;;  %v1677_v19 = vld [vmem:[%s1855_s25 + $0x8] sm:$0xff]   ;;  %v1683_v22 = vld [vmem:[%s1855_s25 + $0x10] sm:$0xff]   ;;  %p251_p4 = scmp.lt.s32.totalorder %s1369_s16, 7 }
  0x11   : > { %1535 = vmatprep.subr.bf16.mxu1 %v1836_v7  ;;  %v1676_v13 = vld [vmem:[%s1855_s25] sm:$0xff]   ;;  %1521 = vmatprep.mubr.bf16.mxu0 %v1675_v12  ;;  %v1678_v20 = vld [vmem:[%s1855_s25 + $0x8] sm:$0xff]   ;;  %v1688_v23 = vld [vmem:[%s1855_s25 + $0x10] sm:$0xff]  }
  0x12   : > { %1545 = vmatprep.mubr.bf16.mxu1 %v1676_v13  ;;  %v1685_v25 = vld [vmem:[%s1855_s25 + $0x18] sm:$0xff]   ;;  %v1691_v28 = vld [vmem:[%s1855_s25] sm:$0xff]   ;;  %v1692_v33 = vld [vmem:[%s1855_s25 + $0x8] sm:$0xff]   ;;  %s2055_s16 = smov (!%p251_p4, %s1369_s16), 7 }
  0x13   : > { %1512 = vmatpush3.bf16.msra.mxu0 %v1830_v6  ;;  %v1690_v26 = vld [vmem:[%s1855_s25 + $0x18] sm:$0xff]   ;;  %v1693_v34 = vld [vmem:[%s1855_s25 + $0x10] sm:$0xff]   ;;  %v1695_v36 = vld [vmem:[%s1855_s25 + $0x8] sm:$0xff]   ;;  %s1432_s22 = sshll.u32 %s2055_s16, 4 }
  0x14   : > { %1536 = vmatpush3.bf16.msra.mxu1 %v1836_v7  ;;  %1513 = vmatprep.subr.bf16.mxu0 %v1844_v8  ;;  %v1694_v35 = vld [vmem:[%s1855_s25 + $0x18] sm:$0xff]   ;;  %v1696_v49 = vld [vmem:[%s1855_s25] sm:$0xff]   ;;  %s255_s19 = scalar_lea.vmem %s2051_s6, %s1432_s22 }
  0x15   : > { %1537 = vmatprep.subr.bf16.mxu1 %v1850_v9  ;;  %v1701_v12 = vld [vmem:[%s2049_s4 + $0x4] ss:$8 sps:$4 sm:$0xff]  }
  0x16   : > { %v1126_v13 = vld [vmem:[%s2050_s5] sm:$0xff] }
  0x17   : > { %1514 = vmatpush3.bf16.msra.mxu0 %v1844_v8 }
  0x18   : > { %1538 = vmatpush3.bf16.msra.mxu1 %v1850_v9  ;;  %1515 = vmatprep.subr.bf16.mxu0 %v1860_v10 }
  0x19   : > { %1539 = vmatprep.subr.bf16.mxu1 %v1866_v11 }
  0x1b   : > { %1516 = vmatpush3.bf16.msra.mxu0 %v1860_v10 }
  0x1c   : > { %1540 = vmatpush3.bf16.msra.mxu1 %v1866_v11  ;;  %1517 = vmatprep.subr.bf16.mxu0 %v1879_v14 }
  0x1d   : > { %1541 = vmatprep.subr.bf16.mxu1 %v1885_v15 }
  0x1f   : > { %1518 = vmatpush3.bf16.msra.mxu0 %v1879_v14 }
  0x20   : > { %1542 = vmatpush3.bf16.msra.mxu1 %v1885_v15  ;;  %1519 = vmatprep.subr.bf16.mxu0 %v1893_v16 }
  0x21   : > { %1543 = vmatprep.subr.bf16.mxu1 %v1899_v17 }
  0x23   : > { %1520 = vmatpush3.bf16.msra.mxu0 %v1893_v16 }
  0x24   : > { %1544 = vmatpush3.bf16.msra.mxu1 %v1899_v17  ;;  %1553 = vmatprep.subr.bf16.mxu0 %v1907_v18 }
  0x25   : > { %1577 = vmatprep.subr.bf16.mxu1 %v1789_v0 }
  0x26   : > { %1522 = vmatmul.mubr.bf16.vlgmr.msra.gmra.mrb[0].mxu0 %v1677_v19 }
  0x27   : > { %1546 = vmatmul.mubr.bf16.vlgmr.msra.gmra.mrb[0].mxu1 %v1678_v20  ;;  %1554 = vmatpush3.bf16.msra.mxu0 %v1907_v18 }
  0x28   : > { %1555 = vmatprep.subr.bf16.mxu0 %v1916_v21  ;;  %1525 = vmatprep.mubr.bf16.mxu0 %v1683_v22 }
  0x29   : > { %1549 = vmatprep.mubr.bf16.mxu1 %v1688_v23  ;;  %1578 = vmatpush3.bf16.msra.mxu1 %v1789_v0  ;;  %v1697_v0 = vld [vmem:[%s1855_s25 + $0x18] sm:$0xff]  }
  0x2a   : > { %1579 = vmatprep.subr.bf16.mxu1 %v1802_v2 }
  0x2b   : > { %1556 = vmatpush3.bf16.msra.mxu0 %v1916_v21 }
  0x2c   : > { %1557 = vmatprep.subr.bf16.mxu0 %v1927_v24 }
  0x2d   : > { %1580 = vmatpush3.bf16.msra.mxu1 %v1802_v2 }
  0x2e   : > { %1526 = vmatmul.mubr.bf16.gmra.mrb[4].mxu0 %v1685_v25  ;;  %1581 = vmatprep.subr.bf16.mxu1 %v1816_v4 }
  0x2f   : > { %1558 = vmatpush3.bf16.msra.mxu0 %v1927_v24  ;;  %1550 = vmatmul.mubr.bf16.gmra.mrb[4].mxu1 %v1690_v26 }
  0x30   : > { %1559 = vmatprep.subr.bf16.mxu0 %v1939_v27  ;;  %1569 = vmatprep.mubr.bf16.mxu0 %v1691_v28 }
  0x31   : > { %1582 = vmatpush3.bf16.msra.mxu1 %v1816_v4 }
  0x32   : > { %1583 = vmatprep.subr.bf16.mxu1 %v1830_v6 }
  0x33   : > { %1560 = vmatpush3.bf16.msra.mxu0 %v1939_v27 }
  0x34   : > { %1561 = vmatprep.subr.bf16.mxu0 %v1949_v29 }
  0x35   : > { %1584 = vmatpush3.bf16.msra.mxu1 %v1830_v6 }
  0x36   : > { %1585 = vmatprep.subr.bf16.mxu1 %v1844_v8 }
  0x37   : > { %1562 = vmatpush3.bf16.msra.mxu0 %v1949_v29 }
  0x38   : > { %1563 = vmatprep.subr.bf16.mxu0 %v1958_v30 }
  0x39   : > { %1586 = vmatpush3.bf16.msra.mxu1 %v1844_v8 }
  0x3a   : > { %1587 = vmatprep.subr.bf16.mxu1 %v1860_v10 }
  0x3b   : > { %1564 = vmatpush3.bf16.msra.mxu0 %v1958_v30 }
  0x3c   : > { %1565 = vmatprep.subr.bf16.mxu0 %v1967_v31 }
  0x3d   : > { %1588 = vmatpush3.bf16.msra.mxu1 %v1860_v10 }
  0x3e   : > { %1589 = vmatprep.subr.bf16.mxu1 %v1879_v14 }
  0x3f   : > { %1566 = vmatpush3.bf16.msra.mxu0 %v1967_v31 }
  0x40   : > { %1567 = vmatprep.subr.bf16.mxu0 %v1976_v32 }
  0x41   : > { %1590 = vmatpush3.bf16.msra.mxu1 %v1879_v14  ;;  %v1742_v14 = vmov 0  }
  0x42   : > { %1591 = vmatprep.subr.bf16.mxu1 %v1893_v16  ;;  %1658 = vset.pattern.permute.xlu0 %v1742_v14 }
  0x43   : > { %1568 = vmatpush3.bf16.msra.mxu0 %v1976_v32  ;;  %1130 = vperm.xlu0 %1658, %v1126_v13  }
  0x44   : > { %1601 = vmatprep.subr.bf16.mxu0 %v1796_v1 }
  0x45   : > { %1592 = vmatpush3.bf16.msra.mxu1 %v1893_v16 }
  0x46   : > { %1570 = vmatmul.mubr.bf16.vlgmr.msra.gmra.mrb[8].mxu0 %v1692_v33  ;;  %1625 = vmatprep.subr.bf16.mxu1 %v1907_v18 }
  0x47   : > { %1573 = vmatprep.mubr.bf16.mxu0 %v1693_v34  ;;  %1602 = vmatpush3.bf16.msra.mxu0 %v1796_v1 }
  0x48   : > { %1603 = vmatprep.subr.bf16.mxu0 %v1809_v3 }
  0x4b   : > { %1604 = vmatpush3.bf16.msra.mxu0 %v1809_v3 }
  0x4c   : > { %1605 = vmatprep.subr.bf16.mxu0 %v1822_v5 }
  0x4e   : > { %1574 = vmatmul.mubr.bf16.gmra.mrb[12].mxu0 %v1694_v35 }
  0x4f   : > { %1606 = vmatpush3.bf16.msra.mxu0 %v1822_v5  ;;  %v1698_v5 = vld [vmem:[%s1855_s25 + $0x10] sm:$0xff]  }
  0x50   : > { %1607 = vmatprep.subr.bf16.mxu0 %v1836_v7 }
  0x53   : > { %1608 = vmatpush3.bf16.msra.mxu0 %v1836_v7 }
  0x54   : > { %1609 = vmatprep.subr.bf16.mxu0 %v1850_v9 }
  0x57   : > { %1610 = vmatpush3.bf16.msra.mxu0 %v1850_v9 }
  0x58   : > { %1611 = vmatprep.subr.bf16.mxu0 %v1866_v11 }
  0x5b   : > { %1612 = vmatpush3.bf16.msra.mxu0 %v1866_v11 }
  0x5c   : > { %1613 = vmatprep.subr.bf16.mxu0 %v1885_v15 }
  0x5f   : > { %1614 = vmatpush3.bf16.msra.mxu0 %v1885_v15  ;;  %v1127_v15 = vld [vmem:[%s2050_s5 + $0x8] sm:$0xff] }
  0x60   : > { %1615 = vmatprep.subr.bf16.mxu0 %v1899_v17  ;;  %1135 = vperm.xlu0 %1658, %v1127_v15  }
  0x63   : > { %1616 = vmatpush3.bf16.msra.mxu0 %v1899_v17 }
  0x64   : > { %1151 = vmatprep.subr.bf16.mxu0 %v1695_v36 }
  0xf9   : > { %v1523_v37 = vpop.f32.mrb[0].mxu0 }
  0xfa   : > { %v1547_v38 = vpop.f32.mrb[0].mxu1  ;;  %v464_v39 = vpop.f32.mrb[1].mxu0 }
  0xfb   : > { %v617_v40 = vpop.f32.mrb[1].mxu1  ;;  %v1524_v41 = vpop.f32.mrb[2].mxu0 }
  0xfc   : > { %v496_v42 = vpack.c.bf16 %v1524_v41, %v1523_v37  ;;  %v1548_v43 = vpop.f32.mrb[2].mxu1  ;;  %v467_v44 = vpop.f32.mrb[3].mxu0 }
  0xfd   : > { %v649_v45 = vpack.c.bf16 %v1548_v43, %v1547_v38  ;;  %v495_v46 = vpack.c.bf16 %v467_v44, %v464_v39  ;;  %v620_v47 = vpop.f32.mrb[3].mxu1 }
  0xfe   : > { %v648_v48 = vpack.c.bf16 %v620_v47, %v617_v40 }
  0xff   : > { %1593 = vmatprep.mubr.bf16.mxu1 %v495_v46 }
 0x100   : > { %1617 = vmatprep.mubr.bf16.mxu0 %v648_v48  ;;  %1594 = vmatmul.mubr.bf16.vlgmr.msra.gmra.mrb[8].mxu1 %v496_v42 }
 0x101   : > { %1618 = vmatmul.mubr.bf16.vlgmr.msra.gmra.mrb[16].mxu0 %v649_v45  ;;  %1626 = vmatpush3.bf16.msra.mxu1 %v1907_v18  ;;  %v1527_v50 = vpop.f32.mrb[4].mxu0 }
 0x102   : > { %1152 = vmatpush1.bf16.msra.mxu0 %v1696_v49  ;;  %1627 = vmatprep.subr.bf16.mxu1 %v1916_v21  ;;  %v480_v51 = vpop.f32.mrb[5].mxu0  ;;  %v1551_v52 = vpop.f32.mrb[4].mxu1 }
 0x103   : > { %1153 = vmatprep.subr.bf16.mxu0 %v1695_v36  ;;  %v1528_v53 = vpop.f32.mrb[6].mxu0  ;;  %v633_v54 = vpop.f32.mrb[5].mxu1 }
 0x104   : > { %v498_v55 = vpack.c.bf16 %v1528_v53, %v1527_v50  ;;  %v483_v56 = vpop.f32.mrb[7].mxu0  ;;  %v1552_v57 = vpop.f32.mrb[6].mxu1 }
 0x105   : > { %1628 = vmatpush3.bf16.msra.mxu1 %v1916_v21  ;;  %v497_v58 = vpack.c.bf16 %v483_v56, %v480_v51  ;;  %v651_v59 = vpack.c.bf16 %v1552_v57, %v1551_v52  ;;  %v636_v60 = vpop.f32.mrb[7].mxu1  ;;  %v1131_v53 = vpop.permute.xlu0 %1130 }
 0x106   : > { %1154 = vmatpush1.bf16.msra.mxu0 %v1696_v49  ;;  %1629 = vmatprep.subr.bf16.mxu1 %v1927_v24  ;;  %v650_v61 = vpack.c.bf16 %v636_v60, %v633_v54 }
 0x107   : > { %1155 = vmatprep.subr.bf16.mxu0 %v1695_v36  ;;  %1597 = vmatprep.mubr.bf16.mxu1 %v497_v58 }
 0x108   : > { %1598 = vmatmul.mubr.bf16.gmra.mrb[12].mxu1 %v498_v55  ;;  %1621 = vmatprep.mubr.bf16.mxu0 %v650_v61 }
 0x109   : > { %1630 = vmatpush3.bf16.msra.mxu1 %v1927_v24  ;;  %1622 = vmatmul.mubr.bf16.gmra.mrb[20].mxu0 %v651_v59 }
 0x10a   : > { %1156 = vmatpush1.bf16.msra.mxu0 %v1696_v49  ;;  %1631 = vmatprep.subr.bf16.mxu1 %v1939_v27 }
 0x10b   : > { %1157 = vmatprep.subr.bf16.mxu0 %v496_v42  ;;  %1414 = vmatprep.mubr.msk.bf16.mxu0 %vm1147_vm0, %v1701_v12 }
 0x10d   : > { %1632 = vmatpush3.bf16.msra.mxu1 %v1939_v27 }
 0x10e   : > { %1158 = vmatpush1.bf16.msra.mxu0 %v495_v46  ;;  %1633 = vmatprep.subr.bf16.mxu1 %v1949_v29  ;;  %v1699_v46 = vld [vmem:[%s2049_s4] ss:$8 sps:$4 sm:$0xff]  }
 0x10f   : > { %1159 = vmatprep.subr.bf16.mxu0 %v649_v45 }
 0x111   : > { %1634 = vmatpush3.bf16.msra.mxu1 %v1949_v29 }
 0x112   : > { %1635 = vmatprep.subr.bf16.mxu1 %v1958_v30  ;;  %1160 = vmatpush1.bf16.msra.mxu0 %v648_v48 }
 0x115   : > { %1636 = vmatpush3.bf16.msra.mxu1 %v1958_v30 }
 0x116   : > { %1637 = vmatprep.subr.bf16.mxu1 %v1967_v31 }
 0x119   : > { %1638 = vmatpush3.bf16.msra.mxu1 %v1967_v31  ;;  %v1571_v62 = vpop.f32.mrb[8].mxu0 }
 0x11a   : > { %v770_v63 = vpop.f32.mrb[9].mxu0  ;;  %1639 = vmatprep.subr.bf16.mxu1 %v1976_v32 }
 0x11b   : > { %v1572_v1 = vpop.f32.mrb[10].mxu0 }
 0x11c   : > { %v802_v2 = vpack.c.bf16 %v1572_v1, %v1571_v62  ;;  %v773_v3 = vpop.f32.mrb[11].mxu0 }
 0x11d   : > { %v801_v4 = vpack.c.bf16 %v773_v3, %v770_v63  ;;  %1640 = vmatpush3.bf16.msra.mxu1 %v1976_v32 }
 0x11e   : > { %1161 = vmatprep.subr.bf16.mxu0 %v802_v2  ;;  %1194 = vmatprep.subr.bf16.mxu1 %v1697_v0 }
 0x11f   : > { %1641 = vmatprep.mubr.bf16.mxu1 %v801_v4  ;;  %1162 = vmatpush1.bf16.msra.mxu0 %v801_v4 }
 0x120   : > { %1642 = vmatmul.mubr.bf16.vlgmr.msra.gmra.mrb[16].mxu1 %v802_v2 }
 0x121   : > { %1195 = vmatpush1.bf16.msra.mxu1 %v1698_v5  ;;  %v1575_v6 = vpop.f32.mrb[12].mxu0 }
 0x122   : > { %v786_v7 = vpop.f32.mrb[13].mxu0  ;;  %1196 = vmatprep.subr.bf16.mxu1 %v1697_v0 }
 0x123   : > { %v1576_v8 = vpop.f32.mrb[14].mxu0 }
 0x124   : > { %v804_v9 = vpack.c.bf16 %v1576_v8, %v1575_v6  ;;  %v789_v10 = vpop.f32.mrb[15].mxu0 }
 0x125   : > { %v803_v11 = vpack.c.bf16 %v789_v10, %v786_v7  ;;  %1197 = vmatpush1.bf16.msra.mxu1 %v1698_v5 }
 0x126   : > { %1198 = vmatprep.subr.bf16.mxu1 %v1697_v0 }
 0x127   : > { %1645 = vmatprep.mubr.bf16.mxu1 %v803_v11 }
 0x128   : > { %1646 = vmatmul.mubr.bf16.gmra.mrb[20].mxu1 %v804_v9 }
 0x129   : > { %1199 = vmatpush1.bf16.msra.mxu1 %v1698_v5  ;;  %1415 = vmatprep.mubr.msk.bf16.mxu1 %vm1147_vm0, %v1701_v12 }
 0x12a   : > { %1200 = vmatprep.subr.bf16.mxu1 %v498_v55  ;;  %v1136_v55 = vpop.permute.xlu0 %1135 }
 0x12d   : > { %1201 = vmatpush1.bf16.msra.mxu1 %v497_v58 }
 0x12e   : > { %1202 = vmatprep.subr.bf16.mxu1 %v651_v59 }
 0x131   : > { %1203 = vmatpush1.bf16.msra.mxu1 %v650_v61 }
 0x132   : > { %1204 = vmatprep.subr.bf16.mxu1 %v804_v9 }
 0x135   : > { %1205 = vmatpush1.bf16.msra.mxu1 %v803_v11 }
 0x1d3   : > { %v1595_v16 = vpop.f32.mrb[8].mxu1 }
 0x1d4   : > { %v871_v17 = vpop.f32.mrb[9].mxu1  ;;  %v1619_v18 = vpop.f32.mrb[16].mxu0 }
 0x1d5   : > { %v1596_v19 = vpop.f32.mrb[10].mxu1  ;;  %v948_v20 = vpop.f32.mrb[17].mxu0 }
 0x1d6   : > { %v903_v21 = vpack.c.bf16 %v1596_v19, %v1595_v16  ;;  %v874_v22 = vpop.f32.mrb[11].mxu1  ;;  %v1620_v23 = vpop.f32.mrb[18].mxu0 }
 0x1d7   : > { %v902_v24 = vpack.c.bf16 %v874_v22, %v871_v17  ;;  %v980_v25 = vpack.c.bf16 %v1620_v23, %v1619_v18  ;;  %v951_v26 = vpop.f32.mrb[19].mxu0 }
 0x1d8   : > { %1163 = vmatprep.subr.bf16.mxu0 %v903_v21  ;;  %v979_v27 = vpack.c.bf16 %v951_v26, %v948_v20 }
 0x1d9   : > { %1164 = vmatpush1.bf16.msra.mxu0 %v902_v24 }
 0x1da   : > { %1165 = vmatprep.subr.bf16.mxu0 %v980_v25 }
 0x1db   : > { %v1599_v28 = vpop.f32.mrb[12].mxu1 }
 0x1dc   : > { %v887_v29 = vpop.f32.mrb[13].mxu1  ;;  %v1623_v30 = vpop.f32.mrb[20].mxu0 }
 0x1dd   : > { %v1600_v31 = vpop.f32.mrb[14].mxu1  ;;  %1166 = vmatpush1.bf16.msra.mxu0 %v979_v27  ;;  %v964_v32 = vpop.f32.mrb[21].mxu0 }
 0x1de   : > { %v905_v33 = vpack.c.bf16 %v1600_v31, %v1599_v28  ;;  %v890_v34 = vpop.f32.mrb[15].mxu1  ;;  %v1624_v35 = vpop.f32.mrb[22].mxu0 }
 0x1df   : > { %v904_v36 = vpack.c.bf16 %v890_v34, %v887_v29  ;;  %v982_v37 = vpack.c.bf16 %v1624_v35, %v1623_v30  ;;  %v967_v38 = vpop.f32.mrb[23].mxu0 }
 0x1e0   : > { %1206 = vmatprep.subr.bf16.mxu1 %v905_v33  ;;  %v981_v39 = vpack.c.bf16 %v967_v38, %v964_v32 }
 0x1e1   : > { %1207 = vmatpush1.bf16.msra.mxu1 %v904_v36 }
 0x1e2   : > { %1208 = vmatprep.subr.bf16.mxu1 %v982_v37 }
 0x1e5   : > { %1209 = vmatpush1.bf16.msra.mxu1 %v981_v39 }
 0x1f3   : > { %v1643_v40 = vpop.f32.mrb[16].mxu1 }
 0x1f4   : > { %v1025_v41 = vpop.f32.mrb[17].mxu1 }
 0x1f5   : > { %v1644_v42 = vpop.f32.mrb[18].mxu1 }
 0x1f6   : > { %v1057_v43 = vpack.c.bf16 %v1644_v42, %v1643_v40  ;;  %v1028_v44 = vpop.f32.mrb[19].mxu1 }
 0x1f7   : > { %v1056_v45 = vpack.c.bf16 %v1028_v44, %v1025_v41 }
 0x1f8   : > { %1167 = vmatprep.subr.bf16.mxu0 %v1057_v43 }
 0x1f9   : > { %1168 = vmatpush1.bf16.msra.mxu0 %v1056_v45 }
 0x1fb   : > { %v1647_v47 = vpop.f32.mrb[20].mxu1 }
 0x1fc   : > { %v1041_v48 = vpop.f32.mrb[21].mxu1  ;;  %1184 = vmatmul.mubr.bf16.vlgmr.msra.gmra.mrb[24].mxu0 %v1699_v46 }
 0x1fd   : > { %v1648_v49 = vpop.f32.mrb[22].mxu1 }
 0x1fe   : > { %v1059_v50 = vpack.c.bf16 %v1648_v49, %v1647_v47  ;;  %v1044_v51 = vpop.f32.mrb[23].mxu1 }
 0x1ff   : > { %v1058_v52 = vpack.c.bf16 %v1044_v51, %v1041_v48 }
 0x200   : > { %1210 = vmatprep.subr.bf16.mxu1 %v1059_v50 }
 0x201   : > { %1211 = vmatpush1.bf16.msra.mxu1 %v1058_v52 }
 0x204   : > { %1227 = vmatmul.mubr.bf16.vlgmr.msra.gmra.mrb[24].mxu1 %v1699_v46 }
 0x2cf   : > { %v1185_v54 = vpop.f32.mrb[24].mxu0 }
 0x2d0   : > { %v1186_v56 = vadd.f32 %v1185_v54, %v1131_v53  ;;  %v1187_v57 = vpop.f32.mrb[25].mxu0 }
 0x2d1   : > { %v1188_v58 = vadd.f32 %v1187_v57, %v1131_v53  ;;  %v1189_v59 = vpop.f32.mrb[26].mxu0 }
 0x2d2   : > { %v1237_v60 = vmax.f32 %v1186_v56, 0.0  ;;  %v1190_v61 = vadd.f32 %v1189_v59, %v1136_v55  ;;  %v1191_v62 = vpop.f32.mrb[27].mxu0 }
 0x2d3   : > { %v1238_v63 = vmax.f32 %v1188_v58, 0.0  ;;  %v1192_v0 = vadd.f32 %v1191_v62, %v1136_v55 }
 0x2d4   : > { %v1416_v1 = vmul.f32 -1.442695, %v1237_v60  ;;  %v1241_v2 = vmax.f32 %v1190_v61, 0.0 }
 0x2d5   : > { %v1417_v3 = vmul.f32 -1.442695, %v1238_v63  ;;  %v1242_v4 = vmax.f32 %v1192_v0, 0.0 }
 0x2d6   : > { %1702 = vpow2.f32 %v1416_v1  ;;  %v1420_v5 = vmul.f32 -1.442695, %v1241_v2 }
 0x2d7   : > { %1704 = vpow2.f32 %v1417_v3  ;;  %v1421_v6 = vmul.f32 -1.442695, %v1242_v4  ;;  %v1228_v7 = vpop.f32.mrb[24].mxu1 }
 0x2d8   : > { %1706 = vpow2.f32 %v1420_v5  ;;  %v1229_v8 = vadd.f32 %v1228_v7, %v1131_v53  ;;  %v1230_v9 = vpop.f32.mrb[25].mxu1 }
 0x2d9   : > { %1708 = vpow2.f32 %v1421_v6  ;;  %v1231_v10 = vadd.f32 %v1230_v9, %v1131_v53  ;;  %v1232_v11 = vpop.f32.mrb[26].mxu1 }
 0x2da   : > { %v1239_v12 = vmax.f32 %v1229_v8, 0.0  ;;  %v1233_v13 = vadd.f32 %v1232_v11, %v1136_v55  ;;  %v1234_v14 = vpop.f32.mrb[27].mxu1 }
 0x2db   : > { %v1240_v15 = vmax.f32 %v1231_v10, 0.0  ;;  %v1235_v16 = vadd.f32 %v1234_v14, %v1136_v55 }
 0x2dc   : > { %v1418_v17 = vmul.f32 -1.442695, %v1239_v12  ;;  %v1243_v18 = vmax.f32 %v1233_v13, 0.0 }
 0x2dd   : > { %v1419_v19 = vmul.f32 -1.442695, %v1240_v15  ;;  %v1244_v20 = vmax.f32 %v1235_v16, 0.0 }
 0x2de   : > { %1710 = vpow2.f32 %v1418_v17  ;;  %v1422_v21 = vmul.f32 -1.442695, %v1243_v18 }
 0x2df   : > { %1712 = vpow2.f32 %v1419_v19  ;;  %v1423_v22 = vmul.f32 -1.442695, %v1244_v20 }
 0x2e0   : > { %v1703_v23 = vpop.eup %1702  ;;  %1714 = vpow2.f32 %v1422_v21 }
 0x2e1   : > { %v1705_v24 = vpop.eup %1704  ;;  %v1269_v25 = vadd.f32 1.0, %v1703_v23  ;;  %1716 = vpow2.f32 %v1423_v22 }
 0x2e2   : > { %v1707_v26 = vpop.eup %1706  ;;  %v1270_v27 = vadd.f32 1.0, %v1705_v24 }
 0x2e3   : > { %v1709_v28 = vpop.eup %1708  ;;  %1718 = vrcp.f32 %v1269_v25  ;;  %v1273_v29 = vadd.f32 1.0, %v1707_v26 }
 0x2e4   : > { %1720 = vrcp.f32 %v1270_v27  ;;  %v1274_v30 = vadd.f32 1.0, %v1709_v28 }
 0x2e5   : > { %1722 = vrcp.f32 %v1273_v29 }
 0x2e6   : > { %1724 = vrcp.f32 %v1274_v30 }
 0x2e8   : > { %v1711_v31 = vpop.eup %1710 }
 0x2e9   : > { %v1713_v32 = vpop.eup %1712  ;;  %v1271_v33 = vadd.f32 1.0, %v1711_v31 }
 0x2ea   : > { %v1715_v34 = vpop.eup %1714  ;;  %v1272_v35 = vadd.f32 1.0, %v1713_v32 }
 0x2eb   : > { %v1717_v36 = vpop.eup %1716  ;;  %1726 = vrcp.f32 %v1271_v33  ;;  %v1275_v37 = vadd.f32 1.0, %v1715_v34 }
 0x2ec   : > { %1728 = vrcp.f32 %v1272_v35  ;;  %v1276_v38 = vadd.f32 1.0, %v1717_v36 }
 0x2ed   : > { %v1719_v39 = vpop.eup %1718  ;;  %1730 = vrcp.f32 %v1275_v37 }
 0x2ee   : > { %v1721_v40 = vpop.eup %1720  ;;  %1293 = vst [vmem:[%s255_s19] sm:$0xff] %v1719_v39  ;;  %1732 = vrcp.f32 %v1276_v38 }
 0x2ef   : > { %v1723_v41 = vpop.eup %1722  ;;  %1424 = vst [vmem:[%s255_s19 + $0x10] sm:$0xff] %v1721_v40 }
 0x2f0   : > { %v1725_v42 = vpop.eup %1724  ;;  %1294 = vst [vmem:[%s255_s19 + $0x8] sm:$0xff] %v1723_v41 }
 0x2f1   : > { %1425 = vst [vmem:[%s255_s19 + $0x18] sm:$0xff] %v1725_v42 }
 0x2f5   : > { %v1727_v43 = vpop.eup %1726 }
 0x2f6   : > { %v1729_v44 = vpop.eup %1728  ;;  %1426 = vst [vmem:[%s255_s19 + $0x20] sm:$0xff] %v1727_v43 }
 0x2f7   : > { %v1731_v45 = vpop.eup %1730  ;;  %1428 = vst [vmem:[%s255_s19 + $0x30] sm:$0xff] %v1729_v44 }
 0x2f8   : > { %v1733_v46 = vpop.eup %1732  ;;  %1427 = vst [vmem:[%s255_s19 + $0x28] sm:$0xff] %v1731_v45 }
 0x2f9   : > { %1429 = vst [vmem:[%s255_s19 + $0x38] sm:$0xff] %v1733_v46 }
 0x2fa PF: > { %s16_s21 = sadd.s32 1, %s1740_s21  }
 0x2fb   : > { %p13_p5 = scmp.ge.s32.totalorder %s16_s21, 4  }
 0x2fd   :  { %15 = sbr.rel (!%p13_p5) target bundleno = 1 (0x1), region = 77 }

// kernel: dlgnn_cell_forward.3
= control target key start
LH: loop header
LB: loop body
LE: loop exit
PB: predicated region body
PF: predicated region fallthrough
CT: control target
= control target key end

     0   :  { %s1842_s27 = smov 0   ;;  %s2120_s0 = inlined_call_operand.vmem [shape: bf16[128,128], index: 0, kind: input, shape index: {}]   ;;  %s2121_s1 = inlined_call_operand.vmem [shape: bf16[128,128], index: 1, kind: input, shape index: {}]   ;;  %s2122_s2 = inlined_call_operand.vmem [shape: bf16[128,128], index: 2, kind: input, shape index: {}]   ;;  %s2123_s3 = inlined_call_operand.vmem [shape: bf16[128,128], index: 3, kind: input, shape index: {}]   ;;  %s2124_s4 = inlined_call_operand.vmem [shape: bf16[8,144], index: 4, kind: input, shape index: {}]   ;;  %s2125_s5 = inlined_call_operand.vmem [shape: f32[8,1], index: 5, kind: input, shape index: {}]   ;;  %s2126_s6 = inlined_call_operand.vmem [shape: f32[8,8,128], index: 6, kind: input, shape index: {}]   ;;  %s2127_s7 = inlined_call_operand.vmem [shape: f32[8,8,128], index: 7, kind: input, shape index: {}]   ;;  %s2128_s8 = inlined_call_operand.vmem [shape: f32[8,8,128], index: 8, kind: output, shape index: {}]  }
   0x1 LB: > { %s1444_s28 = sadd.s32 4294967295, %s1794_s27   ;;  %p1448_p0 = scmp.ge.s32.totalorder %s1794_s27, 1  ;;  %s1794_s27 = sphi %s1842_s27, %s18_s27  }
   0x2   : > { %p285_p1 = scmp.lt.s32.totalorder %s1794_s27, 3 }
   0x4   : > { %p286_p2 = pnand %p1448_p0, %p285_p1 }
   0x5   : > { %v1853_v0 = vld [vmem:[%s2121_s1] sm:$0xff] (!%p286_p2)   ;;  %s1449_s9 = sshll.u32 (!%p286_p2), %s1444_s28, 3  ;;  %v1866_v2 = vld [vmem:[%s2121_s1 + $0x8] sm:$0xff] (!%p286_p2)   ;;  %v1880_v4 = vld [vmem:[%s2121_s1 + $0x10] sm:$0xff] (!%p286_p2)   ;;  %vm1233_vm0 = vcmask (!%p286_p2), 130048  }
   0x6   : > { %289 = sbr.rel (%p286_p2) target bundleno = 749 (0x2ed), region = 52  ;;  %v1860_v1 = vld [vmem:[%s2122_s2] sm:$0xff] (!%p286_p2)   ;;  %1584 = vmatprep.subr.bf16.mxu0 (!%p286_p2), %v1853_v0  ;;  %p330_p3 = scmp.lt.s32.totalorder (!%p286_p2), %s1449_s9, 15  ;;  %v1873_v3 = vld [vmem:[%s2122_s2 + $0x8] sm:$0xff] (!%p286_p2)   ;;  %v1886_v5 = vld [vmem:[%s2122_s2 + $0x10] sm:$0xff] (!%p286_p2)  }
   0x7   : > { %1608 = vmatprep.subr.bf16.mxu1 (!%p286_p2), %v1860_v1  ;;  %1585 = vmatpush3.bf16.msra.mxu0 (!%p286_p2), %v1853_v0  ;;  %v1894_v6 = vld [vmem:[%s2121_s1 + $0x18] sm:$0xff] (!%p286_p2)   ;;  %v1908_v8 = vld [vmem:[%s2121_s1 + $0x20] sm:$0xff] (!%p286_p2)   ;;  %v1924_v10 = vld [vmem:[%s2121_s1 + $0x28] sm:$0xff] (!%p286_p2)  }
   0x8   : > { %1609 = vmatpush3.bf16.msra.mxu1 (!%p286_p2), %v1860_v1  ;;  %1586 = vmatprep.subr.bf16.mxu0 (!%p286_p2), %v1866_v2  ;;  %v1900_v7 = vld [vmem:[%s2122_s2 + $0x18] sm:$0xff] (!%p286_p2)   ;;  %v1914_v9 = vld [vmem:[%s2122_s2 + $0x20] sm:$0xff] (!%p286_p2)   ;;  %v1930_v11 = vld [vmem:[%s2122_s2 + $0x28] sm:$0xff] (!%p286_p2)  }
   0x9   : > { %1610 = vmatprep.subr.bf16.mxu1 (!%p286_p2), %v1873_v3  ;;  %v1943_v14 = vld [vmem:[%s2121_s1 + $0x30] sm:$0xff] (!%p286_p2)   ;;  %v1957_v16 = vld [vmem:[%s2121_s1 + $0x38] sm:$0xff] (!%p286_p2)   ;;  %v1971_v18 = vld [vmem:[%s2123_s3] sm:$0xff] (!%p286_p2)  }
   0xa   : > { %v1949_v15 = vld [vmem:[%s2122_s2 + $0x30] sm:$0xff] (!%p286_p2)   ;;  %v1963_v17 = vld [vmem:[%s2122_s2 + $0x38] sm:$0xff] (!%p286_p2)   ;;  %v1980_v21 = vld [vmem:[%s2123_s3 + $0x8] sm:$0xff] (!%p286_p2)  }
   0xb   : > { %1587 = vmatpush3.bf16.msra.mxu0 (!%p286_p2), %v1866_v2  ;;  %v1991_v24 = vld [vmem:[%s2123_s3 + $0x10] sm:$0xff] (!%p286_p2)   ;;  %v2003_v27 = vld [vmem:[%s2123_s3 + $0x18] sm:$0xff] (!%p286_p2)   ;;  %v2013_v29 = vld [vmem:[%s2123_s3 + $0x20] sm:$0xff] (!%p286_p2)  }
   0xc   : > { %1611 = vmatpush3.bf16.msra.mxu1 (!%p286_p2), %v1873_v3  ;;  %1588 = vmatprep.subr.bf16.mxu0 (!%p286_p2), %v1880_v4  ;;  %v2022_v30 = vld [vmem:[%s2123_s3 + $0x28] sm:$0xff] (!%p286_p2)   ;;  %v2031_v31 = vld [vmem:[%s2123_s3 + $0x30] sm:$0xff] (!%p286_p2)   ;;  %v2040_v32 = vld [vmem:[%s2123_s3 + $0x38] sm:$0xff] (!%p286_p2)  }
   0xd   : > { %s2130_s9 = smov (!%p330_p3, %s1449_s9), 15  ;;  %1612 = vmatprep.subr.bf16.mxu1 %v1886_v5 }
   0xe   : > { %s1450_s24 = sshll.u32 %s2130_s9, 2 }
   0xf   : > { %1589 = vmatpush3.bf16.msra.mxu0 %v1880_v4  ;;  %s1919_s11 = scalar_lea.vmem %s2120_s0, %s1450_s24  ;;  %s1451_s24 = sshll.u32 %s1444_s28, 2 }
  0x10   : > { %1613 = vmatpush3.bf16.msra.mxu1 %v1886_v5  ;;  %1590 = vmatprep.subr.bf16.mxu0 %v1894_v6  ;;  %v1754_v12 = vld [vmem:[%s1919_s11] sm:$0xff]   ;;  %v1756_v19 = vld [vmem:[%s1919_s11 + $0x8] sm:$0xff]   ;;  %v1762_v22 = vld [vmem:[%s1919_s11 + $0x10] sm:$0xff]   ;;  %p336_p4 = scmp.lt.s32.totalorder %s1451_s24, 7 }
  0x11   : > { %1614 = vmatprep.subr.bf16.mxu1 %v1900_v7  ;;  %v1755_v13 = vld [vmem:[%s1919_s11] sm:$0xff]   ;;  %1600 = vmatprep.mubr.bf16.mxu0 %v1754_v12  ;;  %v1757_v20 = vld [vmem:[%s1919_s11 + $0x8] sm:$0xff]   ;;  %v1767_v23 = vld [vmem:[%s1919_s11 + $0x10] sm:$0xff]  }
  0x12   : > { %1624 = vmatprep.mubr.bf16.mxu1 %v1755_v13  ;;  %v1764_v25 = vld [vmem:[%s1919_s11 + $0x18] sm:$0xff]   ;;  %v1770_v28 = vld [vmem:[%s1919_s11] sm:$0xff]   ;;  %v1771_v33 = vld [vmem:[%s1919_s11 + $0x8] sm:$0xff]   ;;  %s2132_s24 = smov (!%p336_p4, %s1451_s24), 7 }
  0x13   : > { %1591 = vmatpush3.bf16.msra.mxu0 %v1894_v6  ;;  %v1769_v26 = vld [vmem:[%s1919_s11 + $0x18] sm:$0xff]   ;;  %v1772_v34 = vld [vmem:[%s1919_s11 + $0x10] sm:$0xff]   ;;  %v1774_v36 = vld [vmem:[%s1919_s11 + $0x8] sm:$0xff]   ;;  %s2097_s25 = sshll.u32 %s2132_s24, 3 }
  0x14   : > { %1615 = vmatpush3.bf16.msra.mxu1 %v1900_v7  ;;  %1592 = vmatprep.subr.bf16.mxu0 %v1908_v8  ;;  %v1773_v35 = vld [vmem:[%s1919_s11 + $0x18] sm:$0xff]   ;;  %v1775_v49 = vld [vmem:[%s1919_s11] sm:$0xff]   ;;  %s339_s28 = scalar_lea.vmem %s2126_s6, %s2097_s25  ;;  %s2107_s9 = scalar_lea.vmem %s2127_s7, %s2097_s25 }
  0x15   : > { %1616 = vmatprep.subr.bf16.mxu1 %v1914_v9  ;;  %v1184_v12 = vld [vmem:[%s2124_s4] sm:$0xff]  ;;  %s351_s14 = scalar_lea.vmem %s2128_s8, %s2097_s25 }
  0x16   : > { %v1498_v13 = vcombine.high %v1184_v12, %v1184_v12 }
  0x17   : > { %1593 = vmatpush3.bf16.msra.mxu0 %v1908_v8 }
  0x18   : > { %1617 = vmatpush3.bf16.msra.mxu1 %v1914_v9  ;;  %1594 = vmatprep.subr.bf16.mxu0 %v1924_v10 }
  0x19   : > { %1618 = vmatprep.subr.bf16.mxu1 %v1930_v11 }
  0x1b   : > { %1595 = vmatpush3.bf16.msra.mxu0 %v1924_v10 }
  0x1c   : > { %1619 = vmatpush3.bf16.msra.mxu1 %v1930_v11  ;;  %1596 = vmatprep.subr.bf16.mxu0 %v1943_v14 }
  0x1d   : > { %1620 = vmatprep.subr.bf16.mxu1 %v1949_v15 }
  0x1f   : > { %1597 = vmatpush3.bf16.msra.mxu0 %v1943_v14 }
  0x20   : > { %1621 = vmatpush3.bf16.msra.mxu1 %v1949_v15  ;;  %1598 = vmatprep.subr.bf16.mxu0 %v1957_v16 }
  0x21   : > { %1622 = vmatprep.subr.bf16.mxu1 %v1963_v17 }
  0x23   : > { %1599 = vmatpush3.bf16.msra.mxu0 %v1957_v16 }
  0x24   : > { %1623 = vmatpush3.bf16.msra.mxu1 %v1963_v17  ;;  %1632 = vmatprep.subr.bf16.mxu0 %v1971_v18 }
  0x25   : > { %1656 = vmatprep.subr.bf16.mxu1 %v1853_v0 }
  0x26   : > { %1601 = vmatmul.mubr.bf16.vlgmr.msra.gmra.mrb[0].mxu0 %v1756_v19 }
  0x27   : > { %1625 = vmatmul.mubr.bf16.vlgmr.msra.gmra.mrb[0].mxu1 %v1757_v20  ;;  %1633 = vmatpush3.bf16.msra.mxu0 %v1971_v18 }
  0x28   : > { %1634 = vmatprep.subr.bf16.mxu0 %v1980_v21  ;;  %1604 = vmatprep.mubr.bf16.mxu0 %v1762_v22 }
  0x29   : > { %1628 = vmatprep.mubr.bf16.mxu1 %v1767_v23  ;;  %1657 = vmatpush3.bf16.msra.mxu1 %v1853_v0  ;;  %v1776_v0 = vld [vmem:[%s1919_s11 + $0x18] sm:$0xff]  }
  0x2a   : > { %1658 = vmatprep.subr.bf16.mxu1 %v1866_v2 }
  0x2b   : > { %1635 = vmatpush3.bf16.msra.mxu0 %v1980_v21 }
  0x2c   : > { %1636 = vmatprep.subr.bf16.mxu0 %v1991_v24 }
  0x2d   : > { %1659 = vmatpush3.bf16.msra.mxu1 %v1866_v2 }
  0x2e   : > { %1605 = vmatmul.mubr.bf16.gmra.mrb[4].mxu0 %v1764_v25  ;;  %1660 = vmatprep.subr.bf16.mxu1 %v1880_v4 }
  0x2f   : > { %1637 = vmatpush3.bf16.msra.mxu0 %v1991_v24  ;;  %1629 = vmatmul.mubr.bf16.gmra.mrb[4].mxu1 %v1769_v26 }
  0x30   : > { %1638 = vmatprep.subr.bf16.mxu0 %v2003_v27  ;;  %1648 = vmatprep.mubr.bf16.mxu0 %v1770_v28 }
  0x31   : > { %1661 = vmatpush3.bf16.msra.mxu1 %v1880_v4 }
  0x32   : > { %1662 = vmatprep.subr.bf16.mxu1 %v1894_v6 }
  0x33   : > { %1639 = vmatpush3.bf16.msra.mxu0 %v2003_v27 }
  0x34   : > { %1640 = vmatprep.subr.bf16.mxu0 %v2013_v29 }
  0x35   : > { %1663 = vmatpush3.bf16.msra.mxu1 %v1894_v6 }
  0x36   : > { %1664 = vmatprep.subr.bf16.mxu1 %v1908_v8 }
  0x37   : > { %1641 = vmatpush3.bf16.msra.mxu0 %v2013_v29 }
  0x38   : > { %1642 = vmatprep.subr.bf16.mxu0 %v2022_v30 }
  0x39   : > { %1665 = vmatpush3.bf16.msra.mxu1 %v1908_v8 }
  0x3a   : > { %1666 = vmatprep.subr.bf16.mxu1 %v1924_v10 }
  0x3b   : > { %1643 = vmatpush3.bf16.msra.mxu0 %v2022_v30 }
  0x3c   : > { %1644 = vmatprep.subr.bf16.mxu0 %v2031_v31 }
  0x3d   : > { %1667 = vmatpush3.bf16.msra.mxu1 %v1924_v10 }
  0x3e   : > { %1668 = vmatprep.subr.bf16.mxu1 %v1943_v14 }
  0x3f   : > { %1645 = vmatpush3.bf16.msra.mxu0 %v2031_v31 }
  0x40   : > { %1646 = vmatprep.subr.bf16.mxu0 %v2040_v32 }
  0x41   : > { %1669 = vmatpush3.bf16.msra.mxu1 %v1943_v14  ;;  %v1221_v14 = vld [vmem:[%s2125_s5] sm:$0xff] }
  0x42   : > { %1670 = vmatprep.subr.bf16.mxu1 %v1957_v16 }
  0x43   : > { %1647 = vmatpush3.bf16.msra.mxu0 %v2040_v32 }
  0x44   : > { %1680 = vmatprep.subr.bf16.mxu0 %v1860_v1 }
  0x45   : > { %1671 = vmatpush3.bf16.msra.mxu1 %v1957_v16 }
  0x46   : > { %1649 = vmatmul.mubr.bf16.vlgmr.msra.gmra.mrb[8].mxu0 %v1771_v33  ;;  %1704 = vmatprep.subr.bf16.mxu1 %v1971_v18 }
  0x47   : > { %1652 = vmatprep.mubr.bf16.mxu0 %v1772_v34  ;;  %1681 = vmatpush3.bf16.msra.mxu0 %v1860_v1 }
  0x48   : > { %1682 = vmatprep.subr.bf16.mxu0 %v1873_v3 }
  0x4b   : > { %1683 = vmatpush3.bf16.msra.mxu0 %v1873_v3 }
  0x4c   : > { %1684 = vmatprep.subr.bf16.mxu0 %v1886_v5 }
  0x4e   : > { %1653 = vmatmul.mubr.bf16.gmra.mrb[12].mxu0 %v1773_v35 }
  0x4f   : > { %1685 = vmatpush3.bf16.msra.mxu0 %v1886_v5  ;;  %v1777_v5 = vld [vmem:[%s1919_s11 + $0x10] sm:$0xff]  }
  0x50   : > { %1686 = vmatprep.subr.bf16.mxu0 %v1900_v7 }
  0x53   : > { %1687 = vmatpush3.bf16.msra.mxu0 %v1900_v7 }
  0x54   : > { %1688 = vmatprep.subr.bf16.mxu0 %v1914_v9 }
  0x57   : > { %1689 = vmatpush3.bf16.msra.mxu0 %v1914_v9 }
  0x58   : > { %1690 = vmatprep.subr.bf16.mxu0 %v1930_v11 }
  0x5b   : > { %1691 = vmatpush3.bf16.msra.mxu0 %v1930_v11 }
  0x5c   : > { %1692 = vmatprep.subr.bf16.mxu0 %v1949_v15 }
  0x5f   : > { %1693 = vmatpush3.bf16.msra.mxu0 %v1949_v15  ;;  %v1796_v15 = vmov 0  }
  0x60   : > { %1694 = vmatprep.subr.bf16.mxu0 %v1963_v17  ;;  %1737 = vset.pattern.permute.xlu0 %v1796_v15 }
  0x61   : > { %1224 = vperm.xlu0 %1737, %v1221_v14  }
  0x63   : > { %1695 = vmatpush3.bf16.msra.mxu0 %v1963_v17 }
  0x64   : > { %1237 = vmatprep.subr.bf16.mxu0 %v1774_v36 }
  0xf9   : > { %v1602_v37 = vpop.f32.mrb[0].mxu0 }
  0xfa   : > { %v1626_v38 = vpop.f32.mrb[0].mxu1  ;;  %v560_v39 = vpop.f32.mrb[1].mxu0 }
  0xfb   : > { %v713_v40 = vpop.f32.mrb[1].mxu1  ;;  %v1603_v41 = vpop.f32.mrb[2].mxu0 }
  0xfc   : > { %v592_v42 = vpack.c.bf16 %v1603_v41, %v1602_v37  ;;  %v1627_v43 = vpop.f32.mrb[2].mxu1  ;;  %v563_v44 = vpop.f32.mrb[3].mxu0 }
  0xfd   : > { %v745_v45 = vpack.c.bf16 %v1627_v43, %v1626_v38  ;;  %v591_v46 = vpack.c.bf16 %v563_v44, %v560_v39  ;;  %v716_v47 = vpop.f32.mrb[3].mxu1 }
  0xfe   : > { %v744_v48 = vpack.c.bf16 %v716_v47, %v713_v40 }
  0xff   : > { %1672 = vmatprep.mubr.bf16.mxu1 %v591_v46 }
 0x100   : > { %1696 = vmatprep.mubr.bf16.mxu0 %v744_v48  ;;  %1673 = vmatmul.mubr.bf16.vlgmr.msra.gmra.mrb[8].mxu1 %v592_v42 }
 0x101   : > { %1697 = vmatmul.mubr.bf16.vlgmr.msra.gmra.mrb[16].mxu0 %v745_v45  ;;  %1705 = vmatpush3.bf16.msra.mxu1 %v1971_v18  ;;  %v1606_v50 = vpop.f32.mrb[4].mxu0 }
 0x102   : > { %1238 = vmatpush1.bf16.msra.mxu0 %v1775_v49  ;;  %1706 = vmatprep.subr.bf16.mxu1 %v1980_v21  ;;  %v576_v51 = vpop.f32.mrb[5].mxu0  ;;  %v1630_v52 = vpop.f32.mrb[4].mxu1 }
 0x103   : > { %1239 = vmatprep.subr.bf16.mxu0 %v1774_v36  ;;  %v1607_v53 = vpop.f32.mrb[6].mxu0  ;;  %v729_v54 = vpop.f32.mrb[5].mxu1 }
 0x104   : > { %v594_v55 = vpack.c.bf16 %v1607_v53, %v1606_v50  ;;  %v579_v56 = vpop.f32.mrb[7].mxu0  ;;  %v1631_v57 = vpop.f32.mrb[6].mxu1 }
 0x105   : > { %1707 = vmatpush3.bf16.msra.mxu1 %v1980_v21  ;;  %v593_v58 = vpack.c.bf16 %v579_v56, %v576_v51  ;;  %v747_v59 = vpack.c.bf16 %v1631_v57, %v1630_v52  ;;  %v732_v60 = vpop.f32.mrb[7].mxu1  ;;  %v1225_v53 = vpop.permute.xlu0 %1224 }
 0x106   : > { %1240 = vmatpush1.bf16.msra.mxu0 %v1775_v49  ;;  %1708 = vmatprep.subr.bf16.mxu1 %v1991_v24  ;;  %v746_v61 = vpack.c.bf16 %v732_v60, %v729_v54 }
 0x107   : > { %1241 = vmatprep.subr.bf16.mxu0 %v1774_v36  ;;  %1676 = vmatprep.mubr.bf16.mxu1 %v593_v58 }
 0x108   : > { %1677 = vmatmul.mubr.bf16.gmra.mrb[12].mxu1 %v594_v55  ;;  %1700 = vmatprep.mubr.bf16.mxu0 %v746_v61 }
 0x109   : > { %1709 = vmatpush3.bf16.msra.mxu1 %v1991_v24  ;;  %1701 = vmatmul.mubr.bf16.gmra.mrb[20].mxu0 %v747_v59 }
 0x10a   : > { %1242 = vmatpush1.bf16.msra.mxu0 %v1775_v49  ;;  %1710 = vmatprep.subr.bf16.mxu1 %v2003_v27 }
 0x10b   : > { %1243 = vmatprep.subr.bf16.mxu0 %v592_v42  ;;  %1499 = vmatprep.mubr.msk.bf16.mxu0 %vm1233_vm0, %v1498_v13 }
 0x10d   : > { %1711 = vmatpush3.bf16.msra.mxu1 %v2003_v27 }
 0x10e   : > { %1244 = vmatpush1.bf16.msra.mxu0 %v591_v46  ;;  %1712 = vmatprep.subr.bf16.mxu1 %v2013_v29  ;;  %v1497_v46 = vcombine.low %v1184_v12, %v1184_v12 }
 0x10f   : > { %1245 = vmatprep.subr.bf16.mxu0 %v745_v45 }
 0x111   : > { %1713 = vmatpush3.bf16.msra.mxu1 %v2013_v29 }
 0x112   : > { %1714 = vmatprep.subr.bf16.mxu1 %v2022_v30  ;;  %1246 = vmatpush1.bf16.msra.mxu0 %v744_v48 }
 0x115   : > { %1715 = vmatpush3.bf16.msra.mxu1 %v2022_v30 }
 0x116   : > { %1716 = vmatprep.subr.bf16.mxu1 %v2031_v31 }
 0x119   : > { %1717 = vmatpush3.bf16.msra.mxu1 %v2031_v31  ;;  %v1650_v62 = vpop.f32.mrb[8].mxu0 }
 0x11a   : > { %v866_v63 = vpop.f32.mrb[9].mxu0  ;;  %1718 = vmatprep.subr.bf16.mxu1 %v2040_v32 }
 0x11b   : > { %v1651_v1 = vpop.f32.mrb[10].mxu0 }
 0x11c   : > { %v898_v2 = vpack.c.bf16 %v1651_v1, %v1650_v62  ;;  %v869_v3 = vpop.f32.mrb[11].mxu0 }
 0x11d   : > { %v897_v4 = vpack.c.bf16 %v869_v3, %v866_v63  ;;  %1719 = vmatpush3.bf16.msra.mxu1 %v2040_v32  ;;  %v1327_v63 = vld [vmem:[%s339_s28] sm:$0xff] }
 0x11e   : > { %1247 = vmatprep.subr.bf16.mxu0 %v898_v2  ;;  %1278 = vmatprep.subr.bf16.mxu1 %v1776_v0 }
 0x11f   : > { %1720 = vmatprep.mubr.bf16.mxu1 %v897_v4  ;;  %1248 = vmatpush1.bf16.msra.mxu0 %v897_v4 }
 0x120   : > { %1721 = vmatmul.mubr.bf16.vlgmr.msra.gmra.mrb[16].mxu1 %v898_v2  ;;  %v1501_v2 = vld [vmem:[%s339_s28 + $0x8] sm:$0xff] }
 0x121   : > { %1279 = vmatpush1.bf16.msra.mxu1 %v1777_v5  ;;  %v1654_v6 = vpop.f32.mrb[12].mxu0 }
 0x122   : > { %v882_v7 = vpop.f32.mrb[13].mxu0  ;;  %1280 = vmatprep.subr.bf16.mxu1 %v1776_v0 }
 0x123   : > { %v1655_v8 = vpop.f32.mrb[14].mxu0 }
 0x124   : > { %v900_v9 = vpack.c.bf16 %v1655_v8, %v1654_v6  ;;  %v885_v10 = vpop.f32.mrb[15].mxu0  ;;  %v1330_v8 = vsub.f32 1.0, %v1327_v63 }
 0x125   : > { %v899_v11 = vpack.c.bf16 %v885_v10, %v882_v7  ;;  %1281 = vmatpush1.bf16.msra.mxu1 %v1777_v5 }
 0x126   : > { %1282 = vmatprep.subr.bf16.mxu1 %v1776_v0 }
 0x127   : > { %1724 = vmatprep.mubr.bf16.mxu1 %v899_v11 }
 0x128   : > { %1725 = vmatmul.mubr.bf16.gmra.mrb[20].mxu1 %v900_v9 }
 0x129   : > { %1283 = vmatpush1.bf16.msra.mxu1 %v1777_v5  ;;  %1500 = vmatprep.mubr.msk.bf16.mxu1 %vm1233_vm0, %v1498_v13  ;;  %v1328_v5 = vld [vmem:[%s2107_s9] sm:$0xff] }
 0x12a   : > { %1284 = vmatprep.subr.bf16.mxu1 %v594_v55  ;;  %v1329_v12 = vmul.f32 %v1328_v5, %v1327_v63 }
 0x12d   : > { %1285 = vmatpush1.bf16.msra.mxu1 %v593_v58 }
 0x12e   : > { %1286 = vmatprep.subr.bf16.mxu1 %v747_v59 }
 0x131   : > { %1287 = vmatpush1.bf16.msra.mxu1 %v746_v61 }
 0x132   : > { %1288 = vmatprep.subr.bf16.mxu1 %v900_v9  ;;  %v1502_v9 = vld [vmem:[%s2107_s9 + $0x8] sm:$0xff] }
 0x133   : > { %v1338_v14 = vmul.f32 %v1502_v9, %v1501_v2 }
 0x135   : > { %1289 = vmatpush1.bf16.msra.mxu1 %v899_v11  ;;  %v1339_v11 = vsub.f32 1.0, %v1501_v2 }
 0x1d3   : > { %v1674_v16 = vpop.f32.mrb[8].mxu1 }
 0x1d4   : > { %v967_v17 = vpop.f32.mrb[9].mxu1  ;;  %v1698_v18 = vpop.f32.mrb[16].mxu0 }
 0x1d5   : > { %v1675_v19 = vpop.f32.mrb[10].mxu1  ;;  %v1044_v20 = vpop.f32.mrb[17].mxu0 }
 0x1d6   : > { %v999_v21 = vpack.c.bf16 %v1675_v19, %v1674_v16  ;;  %v970_v22 = vpop.f32.mrb[11].mxu1  ;;  %v1699_v23 = vpop.f32.mrb[18].mxu0 }
 0x1d7   : > { %v998_v24 = vpack.c.bf16 %v970_v22, %v967_v17  ;;  %v1076_v25 = vpack.c.bf16 %v1699_v23, %v1698_v18  ;;  %v1047_v26 = vpop.f32.mrb[19].mxu0  ;;  %v1504_v18 = vld [vmem:[%s339_s28 + $0x10] sm:$0xff] }
 0x1d8   : > { %1249 = vmatprep.subr.bf16.mxu0 %v999_v21  ;;  %v1075_v27 = vpack.c.bf16 %v1047_v26, %v1044_v20  ;;  %v1507_v20 = vld [vmem:[%s339_s28 + $0x18] sm:$0xff]  ;;  %v1505_v22 = vld [vmem:[%s2107_s9 + $0x10] sm:$0xff]  ;;  %v1349_v23 = vsub.f32 1.0, %v1504_v18 }
 0x1d9   : > { %1250 = vmatpush1.bf16.msra.mxu0 %v998_v24  ;;  %v1508_v24 = vld [vmem:[%s2107_s9 + $0x18] sm:$0xff]  ;;  %v1348_v26 = vmul.f32 %v1505_v22, %v1504_v18 }
 0x1da   : > { %1251 = vmatprep.subr.bf16.mxu0 %v1076_v25  ;;  %v1359_v25 = vsub.f32 1.0, %v1507_v20 }
 0x1db   : > { %v1678_v28 = vpop.f32.mrb[12].mxu1 }
 0x1dc   : > { %v983_v29 = vpop.f32.mrb[13].mxu1  ;;  %v1702_v30 = vpop.f32.mrb[20].mxu0 }
 0x1dd   : > { %v1679_v31 = vpop.f32.mrb[14].mxu1  ;;  %1252 = vmatpush1.bf16.msra.mxu0 %v1075_v27  ;;  %v1060_v32 = vpop.f32.mrb[21].mxu0 }
 0x1de   : > { %v1001_v33 = vpack.c.bf16 %v1679_v31, %v1678_v28  ;;  %v986_v34 = vpop.f32.mrb[15].mxu1  ;;  %v1703_v35 = vpop.f32.mrb[22].mxu0  ;;  %v1358_v28 = vmul.f32 %v1508_v24, %v1507_v20 }
 0x1df   : > { %v1000_v36 = vpack.c.bf16 %v986_v34, %v983_v29  ;;  %v1078_v37 = vpack.c.bf16 %v1703_v35, %v1702_v30  ;;  %v1063_v38 = vpop.f32.mrb[23].mxu0 }
 0x1e0   : > { %1290 = vmatprep.subr.bf16.mxu1 %v1001_v33  ;;  %v1077_v39 = vpack.c.bf16 %v1063_v38, %v1060_v32 }
 0x1e1   : > { %1291 = vmatpush1.bf16.msra.mxu1 %v1000_v36 }
 0x1e2   : > { %1292 = vmatprep.subr.bf16.mxu1 %v1078_v37 }
 0x1e5   : > { %1293 = vmatpush1.bf16.msra.mxu1 %v1077_v39 }
 0x1f3   : > { %v1722_v40 = vpop.f32.mrb[16].mxu1 }
 0x1f4   : > { %v1121_v41 = vpop.f32.mrb[17].mxu1 }
 0x1f5   : > { %v1723_v42 = vpop.f32.mrb[18].mxu1 }
 0x1f6   : > { %v1153_v43 = vpack.c.bf16 %v1723_v42, %v1722_v40  ;;  %v1124_v44 = vpop.f32.mrb[19].mxu1 }
 0x1f7   : > { %v1152_v45 = vpack.c.bf16 %v1124_v44, %v1121_v41 }
 0x1f8   : > { %1253 = vmatprep.subr.bf16.mxu0 %v1153_v43 }
 0x1f9   : > { %1254 = vmatpush1.bf16.msra.mxu0 %v1152_v45 }
 0x1fb   : > { %v1726_v47 = vpop.f32.mrb[20].mxu1 }
 0x1fc   : > { %v1137_v48 = vpop.f32.mrb[21].mxu1  ;;  %1270 = vmatmul.mubr.bf16.vlgmr.msra.gmra.mrb[24].mxu0 %v1497_v46 }
 0x1fd   : > { %v1727_v49 = vpop.f32.mrb[22].mxu1 }
 0x1fe   : > { %v1155_v50 = vpack.c.bf16 %v1727_v49, %v1726_v47  ;;  %v1140_v51 = vpop.f32.mrb[23].mxu1 }
 0x1ff   : > { %v1154_v52 = vpack.c.bf16 %v1140_v51, %v1137_v48 }
 0x200   : > { %1294 = vmatprep.subr.bf16.mxu1 %v1155_v50 }
 0x201   : > { %1295 = vmatpush1.bf16.msra.mxu1 %v1154_v52 }
 0x204   : > { %1311 = vmatmul.mubr.bf16.vlgmr.msra.gmra.mrb[24].mxu1 %v1497_v46 }
 0x2cf   : > { %v1271_v54 = vpop.f32.mrb[24].mxu0 }
 0x2d0   : > { %v1273_v55 = vpop.f32.mrb[25].mxu0  ;;  %v1272_v56 = vadd.f32 %v1271_v54, %v1225_v53 }
 0x2d1   : > { %v1274_v57 = vadd.f32 %v1273_v55, %v1225_v53  ;;  %v1275_v58 = vpop.f32.mrb[26].mxu0 }
 0x2d2   : > { %v1319_v59 = vmax.f32 %v1272_v56, 0.0  ;;  %v1276_v60 = vpop.f32.mrb[27].mxu0 }
 0x2d3   : > { %v1320_v61 = vmax.f32 %v1274_v57, 0.0 }
 0x2d4   : > { %1780 = vtanh.f32 %v1319_v59 }
 0x2d5   : > { %1782 = vtanh.f32 %v1320_v61 }
 0x2d7   : > { %v1312_v62 = vpop.f32.mrb[24].mxu1 }
 0x2d8   : > { %v1313_v0 = vadd.f32 %v1312_v62, %v1225_v53  ;;  %v1314_v1 = vpop.f32.mrb[25].mxu1 }
 0x2d9   : > { %v1315_v3 = vadd.f32 %v1314_v1, %v1225_v53  ;;  %v1316_v4 = vpop.f32.mrb[26].mxu1 }
 0x2da   : > { %v1321_v6 = vmax.f32 %v1313_v0, 0.0  ;;  %v1317_v7 = vpop.f32.mrb[27].mxu1 }
 0x2db   : > { %v1322_v10 = vmax.f32 %v1315_v3, 0.0 }
 0x2dc   : > { %1784 = vtanh.f32 %v1321_v6 }
 0x2dd   : > { %1786 = vtanh.f32 %v1322_v10 }
 0x2de   : > { %v1781_v13 = vpop.eup %1780 }
 0x2df   : > { %v1783_v15 = vpop.eup %1782  ;;  %v1331_v16 = vmul.f32 %v1781_v13, %v1330_v8 }
 0x2e0   : > { %v1340_v17 = vmul.f32 %v1783_v15, %v1339_v11 }
 0x2e1   : > { %v1332_v19 = vadd.f32 %v1331_v16, %v1329_v12 }
 0x2e2   : > { %v1341_v21 = vadd.f32 %v1340_v17, %v1338_v14 }
 0x2e3   : > { %1333 = vst [vmem:[%s351_s14] sm:$0xff] %v1332_v19 }
 0x2e4   : > { %1503 = vst [vmem:[%s351_s14 + $0x8] sm:$0xff] %v1341_v21 }
 0x2e6   : > { %v1785_v27 = vpop.eup %1784 }
 0x2e7   : > { %v1787_v29 = vpop.eup %1786  ;;  %v1350_v30 = vmul.f32 %v1785_v27, %v1349_v23 }
 0x2e8   : > { %v1360_v31 = vmul.f32 %v1787_v29, %v1359_v25 }
 0x2e9   : > { %v1351_v32 = vadd.f32 %v1350_v30, %v1348_v26 }
 0x2ea   : > { %v1361_v33 = vadd.f32 %v1360_v31, %v1358_v28 }
 0x2eb   : > { %1506 = vst [vmem:[%s351_s14 + $0x10] sm:$0xff] %v1351_v32 }
 0x2ec   : > { %1509 = vst [vmem:[%s351_s14 + $0x18] sm:$0xff] %v1361_v33 }
 0x2ed PF: > { %s18_s27 = sadd.s32 1, %s1794_s27  }
 0x2ee   : > { %p15_p5 = scmp.ge.s32.totalorder %s18_s27, 4  }
 0x2f0   :  { %17 = sbr.rel (!%p15_p5) target bundleno = 1 (0x1), region = 97 }

</bundles_post_ra>
